<compile_context>
chip_gen: v5e
topology: v5e:2x2
jax: 0.10.0
libtpu: 0.0.40
codegen_flags: <defaults>
</compile_context>

<pallas_src>
import functools
import math

import numpy as np
import jax
import jax.numpy as jnp
from jax.experimental import pallas as pl
from jax.experimental.pallas import tpu as pltpu


# ----------------------------------------------------------------------------- #
# In-kernel helpers
# ----------------------------------------------------------------------------- #
def _mm(a, b):
    # a @ b on the MXU with f32 accumulation.
    return jax.lax.dot_general(a, b, (((1,), (0,)), ((), ())),
                               preferred_element_type=jnp.float32)


def _mm_t(a, b):
    # a @ b.T without materializing a transpose.
    return jax.lax.dot_general(a, b, (((1,), (1,)), ((), ())),
                               preferred_element_type=jnp.float32)


def _erf(x):
    # Abramowitz & Stegun 7.1.26 (|err| <= 1.5e-7) -> exact (non-tanh) F.gelu
    # semantics to f32 rounding level without relying on a lax.erf lowering.
    a = jnp.abs(x)
    t = 1.0 / (1.0 + 0.3275911 * a)
    poly = ((((1.061405429 * t - 1.453152027) * t + 1.421413741) * t
             - 0.284496736) * t + 0.254829592) * t
    y = 1.0 - poly * jnp.exp(-(a * a))
    return jnp.where(x < 0.0, -y, y)


def _gelu_exact(x):
    return 0.5 * x * (1.0 + _erf(x * (1.0 / math.sqrt(2.0))))


# ----------------------------------------------------------------------------- #
# The fused forward kernel
# ----------------------------------------------------------------------------- #
# TODO(synk): kernel is specialized to this metadata (2 node types, exactly one
# incoming relation per destination type); general metadata would generate the
# per-destination blocks from data.metadata() the same way.
def _swg_fused_kernel(xin_ref, graph_ref, misc_ref, qkvw_ref, outw_ref, bias_ref,
                      out_ref, *, heads, head_dim, num_layers, npad, lpad,
                      lin_rows, one_minus_alpha):
    C = heads * head_dim

    # ---- unpack the packed static slabs (static slices, stay in vregs) ----
    mask_r = graph_ref[0:npad, :]                             # [npad, npad]
    mask_c = graph_ref[npad:2 * npad, :]                      # [npad, npad]
    gath_r = graph_ref[2 * npad:2 * npad + lpad, :]           # [lpad, npad]
    gath_c = graph_ref[2 * npad + lpad:2 * npad + 2 * lpad, :]

    lin_w = misc_ref[0:lin_rows, :]                           # [2*fpad, C]
    m1w_r = misc_ref[lin_rows:lin_rows + C, :]                # [C, C]
    m1w_c = misc_ref[lin_rows + C:lin_rows + 2 * C, :]        # [C, C]
    m2w = misc_ref[lin_rows + 2 * C:lin_rows + 3 * C, 0:1]    # [C, 1]

    brow0 = bias_ref[0:1, :]                                  # [1, 4C]
    lin_b_r = brow0[:, 0:C]
    lin_b_c = brow0[:, C:2 * C]
    m1b = brow0[:, 2 * C:3 * C]
    m2b = brow0[:, 3 * C:3 * C + 1]

    # ---- per-type input projection + ReLU: ONE matmul for both node types ----
    # xin / lin_w are block-diagonal over (type-rows x type-feature-lanes), so
    # restaurant rows only pick up restaurant weights and vice versa.
    h_all = _mm(xin_ref[...], lin_w)                          # [2*npad, C]
    h_r = jnp.maximum(h_all[0:npad, :] + lin_b_r, 0.0)
    h_c = jnp.maximum(h_all[npad:2 * npad, :] + lin_b_c, 0.0)

    def attend(q, k, v, mask):
        # Per-head masked softmax attention.  Scale, relation prior and the
        # k_rel/v_rel transforms are already folded into the k/v weights.
        aggs = []
        for h in range(heads):                                # unrolled (heads==2)
            sl = slice(h * head_dim, (h + 1) * head_dim)
            s = _mm_t(q[:, sl], k[:, sl])                     # [nd, ns]
            s = jnp.where(mask > 0.0, s, -1e30)               # mask BEFORE max
            smax = jnp.max(s, axis=-1, keepdims=True)
            e = jnp.exp(s - smax) * mask                      # empty rows -> 0
            den = jnp.sum(e, axis=-1, keepdims=True)
            inv = pl.reciprocal(jnp.where(den > 0.0, den, 1.0), approx=True)
            aggs.append(_mm(e, v[:, sl]) * inv)               # normalize after agg
        return jnp.concatenate(aggs, axis=-1)                 # [nd, C]

    for l in range(num_layers):                               # unrolled, VMEM-resident
        ir, ic = 2 * l, 2 * l + 1
        br = bias_ref[1 + ir:2 + ir, :]                       # [1, 4C]
        bc = bias_ref[1 + ic:2 + ic, :]

        # fused q|k|v projection: one matmul per (layer, type)
        proj_r = _mm(h_r, qkvw_ref[ir]) + br[:, 0:3 * C]      # [npad, 3C]
        proj_c = _mm(h_c, qkvw_ref[ic]) + bc[:, 0:3 * C]

        # dst = restaurant (src = customer), dst = customer (src = restaurant)
        agg_r = attend(proj_r[:, 0:C], proj_c[:, C:2 * C], proj_c[:, 2 * C:3 * C], mask_r)
        agg_c = attend(proj_c[:, 0:C], proj_r[:, C:2 * C], proj_r[:, 2 * C:3 * C], mask_c)

        # single out-projection over both heads; Wo/bo are alpha-scaled host-side
        o_r = _mm(_gelu_exact(agg_r), outw_ref[ir]) + br[:, 3 * C:4 * C]
        o_c = _mm(_gelu_exact(agg_c), outw_ref[ic]) + bc[:, 3 * C:4 * C]

        h_r = o_r + one_minus_alpha[ir] * h_r
        h_c = o_c + one_minus_alpha[ic] * h_c

    # ---- edge-pair readout: one-hot gather via MXU, split-weight concat, MLP ----
    gr = _mm(gath_r, h_r)                                     # == h_r[row]
    gc = _mm(gath_c, h_c)                                     # == h_c[col]
    hid = jnp.maximum(_mm(gr, m1w_r) + _mm(gc, m1w_c) + m1b, 0.0)
    pred = _mm(hid, m2w) + m2b                                # [lpad, 1]

    # ---- single packed output slab: [h_r | h_c | pred] along rows ----
    out_ref[0:npad, :] = h_r
    out_ref[npad:2 * npad, :] = h_c
    out_ref[2 * npad:2 * npad + lpad, :] = jnp.broadcast_to(pred, (lpad, C))


# ----------------------------------------------------------------------------- #
# Host-side preparation (once per graph / parameters) and the forward wrapper
# ----------------------------------------------------------------------------- #
def _ceil8(x):
    return int(-(-int(x) // 8) * 8)


def swg_prepare(params, edge_index_dict, tr_edge_label_index, num_nodes,
                *, heads, head_dim):
    """Pure-host (numpy) pre-processing: fold k_rel/v_rel, score scale, relation
    prior and sigmoid(skip) into packed per-(layer,type) weight slabs, build
    block-diagonal input-projection / readout slabs and the adjacency-mask +
    one-hot gather slab, all as a handful of lane/sublane-packed arrays."""
    C = heads * head_dim
    D = head_dim
    scale = 1.0 / math.sqrt(D)
    types = ["restaurant", "customer"]
    n_r, n_c = num_nodes["restaurant"], num_nodes["customer"]
    num_layers = len(params["convs"])

    def _np(a):
        return np.asarray(a, dtype=np.float32)

    def _edge(src, dst):
        return next(e for e in edge_index_dict if e[0] == src and e[2] == dst)

    npad = max(_ceil8(n_r), _ceil8(n_c))
    lbl = np.asarray(tr_edge_label_index)
    n_lbl = int(lbl.shape[1])
    lpad = _ceil8(n_lbl)

    # --- graph slab: masks (dst-rows x src-cols) + one-hot gathers, row-packed ---
    graph = np.zeros((2 * npad + 2 * lpad, npad), np.float32)
    ei = np.asarray(edge_index_dict[_edge("customer", "restaurant")])
    graph[ei[1], ei[0]] = 1.0                                   # mask_r[dst_r, src_c]
    ei = np.asarray(edge_index_dict[_edge("restaurant", "customer")])
    graph[npad + ei[1], ei[0]] = 1.0                            # mask_c[dst_c, src_r]
    graph[2 * npad + np.arange(n_lbl), lbl[0]] = 1.0            # gath_r (one-hot rows)
    graph[2 * npad + lpad + np.arange(n_lbl), lbl[1]] = 1.0     # gath_c

    # --- misc weight slab: stacked input projections + readout MLP weights ---
    linw_r = _np(params["lin_w"]["restaurant"])                 # [f_r, C]
    linw_c = _np(params["lin_w"]["customer"])                   # [f_c, C]
    f_r, f_c = linw_r.shape[0], linw_c.shape[0]
    fpad = _ceil8(max(f_r, f_c))
    lin_rows = 2 * fpad
    (m1w, m1b), (m2w, m2b) = params["mlp"]
    m1w, m1b, m2w, m2b = _np(m1w), _np(m1b), _np(m2w), _np(m2b)
    misc = np.zeros((lin_rows + 3 * C, C), np.float32)
    misc[0:f_r, :] = linw_r                                     # restaurant feat lanes
    misc[fpad:fpad + f_c, :] = linw_c                           # customer feat lanes
    misc[lin_rows:lin_rows + C, :] = m1w[0:C, :]                # MLP1 restaurant half
    misc[lin_rows + C:lin_rows + 2 * C, :] = m1w[C:2 * C, :]    # MLP1 customer half
    misc[lin_rows + 2 * C:lin_rows + 3 * C, 0] = m2w[:, 0]      # MLP2

    # --- per-(layer,type) fused q|k|v weights, alpha-scaled Wo, packed biases ---
    qkvw = np.zeros((2 * num_layers, C, 3 * C), np.float32)
    outw = np.zeros((2 * num_layers, C, C), np.float32)
    biases = np.zeros((_ceil8(1 + 2 * num_layers), 4 * C), np.float32)
    one_minus_alpha = []
    biases[0, 0:C] = _np(params["lin_b"]["restaurant"])
    biases[0, C:2 * C] = _np(params["lin_b"]["customer"])
    biases[0, 2 * C:3 * C] = m1b
    biases[0, 3 * C] = m2b[0]

    for l, cp in enumerate(params["convs"]):
        for t, nt in enumerate(types):
            other = types[1 - t]
            et = _edge(nt, other)                 # relation where nt is SOURCE
            idx = 2 * l + t
            w, b = _np(cp["kqv_w"][nt]), _np(cp["kqv_b"][nt])
            k_rel, v_rel = _np(cp["k_rel"][et]), _np(cp["v_rel"][et])
            p_rel = _np(cp["p_rel"][et])
            # kqv tensor_split order: k, q, v.  Fold relation transforms into k/v
            # and fold 1/sqrt(d)*p_rel per head into the k columns.
            w_q, b_q = w[:, C:2 * C].copy(), b[C:2 * C].copy()
            w_k, b_k = w[:, 0:C] @ k_rel, b[0:C] @ k_rel
            w_v, b_v = w[:, 2 * C:3 * C] @ v_rel, b[2 * C:3 * C] @ v_rel
            for h in range(heads):
                sl = slice(h * D, (h + 1) * D)
                ps = np.float32(scale * float(p_rel[h]))
                w_k[:, sl] *= ps
                b_k[sl] *= ps
            qkvw[idx] = np.concatenate([w_q, w_k, w_v], axis=1)
            biases[1 + idx, 0:3 * C] = np.concatenate([b_q, b_k, b_v])
            alpha = 1.0 / (1.0 + math.exp(-float(cp["skip"][nt])))
            outw[idx] = np.float32(alpha) * _np(cp["out_w"][nt])
            biases[1 + idx, 3 * C:4 * C] = np.float32(alpha) * _np(cp["out_b"][nt])
            one_minus_alpha.append(1.0 - alpha)

    return dict(
        graph=jnp.asarray(graph), misc=jnp.asarray(misc),
        qkvw=jnp.asarray(qkvw), outw=jnp.asarray(outw), biases=jnp.asarray(biases),
        npad=npad, lpad=lpad, fpad=fpad, lin_rows=lin_rows,
        one_minus_alpha=tuple(one_minus_alpha),
        heads=heads, head_dim=head_dim, num_layers=num_layers,
        n_r=n_r, n_c=n_c, n_lbl=n_lbl, f_r=f_r, f_c=f_c,
    )


def swg_forward(x_dict, static):
    """Single fused pallas_call (no grid, whole-array VMEM residency) for the
    whole forward pass; returns (pred, x_dict_out)."""
    heads, head_dim = static["heads"], static["head_dim"]
    C = heads * head_dim
    npad, lpad, fpad = static["npad"], static["lpad"], static["fpad"]
    n_r, n_c, n_lbl = static["n_r"], static["n_c"], static["n_lbl"]
    f_r, f_c = static["f_r"], static["f_c"]

    x_r = x_dict["restaurant"].astype(jnp.float32)
    x_c = x_dict["customer"].astype(jnp.float32)

    # Packed feature slab: restaurant rows use lanes [0, f_r), customer rows use
    # lanes [fpad, fpad+f_c) -> one block-diagonal projection matmul in-kernel.
    xin = jnp.zeros((2 * npad, 2 * fpad), jnp.float32)
    xin = xin.at[0:n_r, 0:f_r].set(x_r)
    xin = xin.at[npad:npad + n_c, fpad:fpad + f_c].set(x_c)

    inputs = (xin, static["graph"], static["misc"], static["qkvw"],
              static["outw"], static["biases"])
    kern = functools.partial(
        _swg_fused_kernel, heads=heads, head_dim=head_dim,
        num_layers=static["num_layers"], npad=npad, lpad=lpad,
        lin_rows=static["lin_rows"], one_minus_alpha=static["one_minus_alpha"])

    out = pl.pallas_call(
        kern,
        in_specs=[pl.BlockSpec(memory_space=pltpu.MemorySpace.VMEM)
                  for _ in inputs],
        out_specs=pl.BlockSpec(memory_space=pltpu.MemorySpace.VMEM),
        out_shape=jax.ShapeDtypeStruct((2 * npad + lpad, C), jnp.float32),
    )(*inputs)

    pred = out[2 * npad:2 * npad + n_lbl, 0]
    x_out = {"restaurant": out[0:n_r, :], "customer": out[npad:npad + n_c, :]}
    return pred, x_out


# ----------------------------------------------------------------------------- #
# Main: deterministic synthetic data + parameters
# ----------------------------------------------------------------------------- #
def _block_diag(mats):
    d = mats[0].shape[0]
    h = len(mats)
    out = jnp.zeros((h * d, h * d), jnp.float32)
    for i, m in enumerate(mats):
        out = out.at[i * d:(i + 1) * d, i * d:(i + 1) * d].set(m)
    return out


if __name__ == "__main__":
    hidden = 32
    heads = 2
    num_layers = 2
    head_dim = hidden // heads
    node_types = ["restaurant", "customer"]
    edge_types = [("customer", "rates", "restaurant"),
                  ("restaurant", "rev_rates", "customer")]
    feat_dims = {"restaurant": 10, "customer": 6}
    num_nodes = {"restaurant": 12, "customer": 16}
    mlp_hidden_layers = [2 * hidden, hidden, 1]
    n_lbl = 8

    key = jax.random.PRNGKey(0)
    _keys = iter(jax.random.split(key, 256))

    def nk():
        return next(_keys)

    def w(shape, s=0.2):
        return s * jax.random.normal(nk(), shape, jnp.float32)

    # ---- inputs ----
    x_dict = {nt: jax.random.normal(nk(), (num_nodes[nt], feat_dims[nt]), jnp.float32)
              for nt in node_types}
    edge_index_dict = {}
    for et in edge_types:
        src, _, dst = et
        adj = np.asarray(jax.random.bernoulli(nk(), 0.3, (num_nodes[dst], num_nodes[src])))
        d_idx, s_idx = np.nonzero(adj)
        edge_index_dict[et] = jnp.asarray(np.stack([s_idx, d_idx]).astype(np.int32))
    row = jax.random.randint(nk(), (n_lbl,), 0, num_nodes["restaurant"])
    col = jax.random.randint(nk(), (n_lbl,), 0, num_nodes["customer"])
    tr_edge_label_index = jnp.stack([row, col]).astype(jnp.int32)

    # ---- parameters (deterministic synthetic init) ----
    params = {
        "lin_w": {nt: w((feat_dims[nt], hidden)) for nt in node_types},
        "lin_b": {nt: jnp.zeros((hidden,), jnp.float32) for nt in node_types},
        "convs": [],
        "mlp": [],
    }
    for _ in range(num_layers):
        cp = {
            "kqv_w": {nt: w((hidden, 3 * hidden)) for nt in node_types},
            "kqv_b": {nt: jnp.zeros((3 * hidden,), jnp.float32) for nt in node_types},
            "k_rel": {et: _block_diag([w((head_dim, head_dim)) for _ in range(heads)])
                      for et in edge_types},
            "v_rel": {et: _block_diag([w((head_dim, head_dim)) for _ in range(heads)])
                      for et in edge_types},
            "p_rel": {et: jnp.ones((heads,), jnp.float32) for et in edge_types},
            "out_w": {nt: w((hidden, hidden)) for nt in node_types},
            "out_b": {nt: jnp.zeros((hidden,), jnp.float32) for nt in node_types},
            "skip": {nt: jnp.ones((), jnp.float32) for nt in node_types},
        }
        params["convs"].append(cp)
    for i in range(len(mlp_hidden_layers) - 1):
        params["mlp"].append(
            (w((mlp_hidden_layers[i], mlp_hidden_layers[i + 1])),
             jnp.zeros((mlp_hidden_layers[i + 1],), jnp.float32))
        )
    # TODO(synk): mlp_dropout is inference-mode identity here (no dropout applied).

    # ---- run ----
    static = swg_prepare(params, edge_index_dict, tr_edge_label_index, num_nodes,
                         heads=heads, head_dim=head_dim)
    pred, x_out = swg_forward(x_dict, static)
    jax.block_until_ready(pred)
    jax.block_until_ready(x_out)
    assert pred.shape == (n_lbl,)
    assert all(x_out[nt].shape == (num_nodes[nt], hidden) for nt in node_types)
    print("KERNEL_OK")
</pallas_src>

<mosaic_0001>
module attributes {stable_mosaic.version = 11 : i64} {
  func.func @_swg_fused_kernel(%arg0: memref<32x32xf32, #tpu.memory_space<vmem>>, %arg1: memref<48x16xf32, #tpu.memory_space<vmem>>, %arg2: memref<128x32xf32, #tpu.memory_space<vmem>>, %arg3: memref<4x32x96xf32, #tpu.memory_space<vmem>>, %arg4: memref<4x32x32xf32, #tpu.memory_space<vmem>>, %arg5: memref<8x128xf32, #tpu.memory_space<vmem>>, %arg6: memref<40x32xf32, #tpu.memory_space<vmem>>) attributes {dimension_semantics = [], scalar_prefetch = 0 : i64, scratch_operands = 0 : i64, tpu.core_type = #tpu.core_type<tc>} {
    %c0 = arith.constant 0 : index
    %c0_0 = arith.constant 0 : index
    %0 = vector.load %arg1[%c0, %c0_0] : memref<48x16xf32, #tpu.memory_space<vmem>>, vector<16x16xf32>
    %c16 = arith.constant 16 : index
    %c0_1 = arith.constant 0 : index
    %1 = vector.load %arg1[%c16, %c0_1] : memref<48x16xf32, #tpu.memory_space<vmem>>, vector<16x16xf32>
    %c32 = arith.constant 32 : index
    %c0_2 = arith.constant 0 : index
    %2 = vector.load %arg1[%c32, %c0_2] : memref<48x16xf32, #tpu.memory_space<vmem>>, vector<8x16xf32>
    %c40 = arith.constant 40 : index
    %c0_3 = arith.constant 0 : index
    %3 = vector.load %arg1[%c40, %c0_3] : memref<48x16xf32, #tpu.memory_space<vmem>>, vector<8x16xf32>
    %c0_4 = arith.constant 0 : index
    %c0_5 = arith.constant 0 : index
    %4 = vector.load %arg2[%c0_4, %c0_5] : memref<128x32xf32, #tpu.memory_space<vmem>>, vector<32x32xf32>
    %c32_6 = arith.constant 32 : index
    %c0_7 = arith.constant 0 : index
    %5 = vector.load %arg2[%c32_6, %c0_7] : memref<128x32xf32, #tpu.memory_space<vmem>>, vector<32x32xf32>
    %c64 = arith.constant 64 : index
    %c0_8 = arith.constant 0 : index
    %6 = vector.load %arg2[%c64, %c0_8] : memref<128x32xf32, #tpu.memory_space<vmem>>, vector<32x32xf32>
    %c96 = arith.constant 96 : index
    %c0_9 = arith.constant 0 : index
    %7 = vector.load %arg2[%c96, %c0_9] : memref<128x32xf32, #tpu.memory_space<vmem>>, vector<32x1xf32>
    %c0_10 = arith.constant 0 : index
    %c0_11 = arith.constant 0 : index
    %8 = vector.load %arg5[%c0_10, %c0_11] : memref<8x128xf32, #tpu.memory_space<vmem>>, vector<1x128xf32>
    %9 = vector.extract_strided_slice %8 {offsets = [0, 0], sizes = [1, 32], strides = [1, 1]} : vector<1x128xf32> to vector<1x32xf32>
    %10 = vector.extract_strided_slice %8 {offsets = [0, 32], sizes = [1, 32], strides = [1, 1]} : vector<1x128xf32> to vector<1x32xf32>
    %11 = vector.extract_strided_slice %8 {offsets = [0, 64], sizes = [1, 32], strides = [1, 1]} : vector<1x128xf32> to vector<1x32xf32>
    %12 = vector.extract_strided_slice %8 {offsets = [0, 96], sizes = [1, 1], strides = [1, 1]} : vector<1x128xf32> to vector<1x1xf32>
    %c0_12 = arith.constant 0 : index
    %c0_13 = arith.constant 0 : index
    %13 = vector.load %arg0[%c0_12, %c0_13] : memref<32x32xf32, #tpu.memory_space<vmem>>, vector<32x32xf32>
    %cst = arith.constant dense<0.000000e+00> : vector<32x32xf32>
    %14 = tpu.matmul %13, %4, %cst {dimension_numbers = #tpu.dot_dimension_numbers<[1], [0], [0], [1], [0, 0, 1, 1], [], []>} : vector<32x32xf32>, vector<32x32xf32>, vector<32x32xf32> -> vector<32x32xf32>
    %15 = vector.extract_strided_slice %14 {offsets = [0, 0], sizes = [16, 32], strides = [1, 1]} : vector<32x32xf32> to vector<16x32xf32>
    %16 = vector.broadcast %9 : vector<1x32xf32> to vector<16x32xf32>
    %17 = arith.addf %15, %16 : vector<16x32xf32>
    %cst_14 = arith.constant 0.000000e+00 : f32
    %18 = vector.broadcast %cst_14 : f32 to vector<16x32xf32>
    %19 = arith.maximumf %17, %18 : vector<16x32xf32>
    %20 = vector.extract_strided_slice %14 {offsets = [16, 0], sizes = [16, 32], strides = [1, 1]} : vector<32x32xf32> to vector<16x32xf32>
    %21 = vector.broadcast %10 : vector<1x32xf32> to vector<16x32xf32>
    %22 = arith.addf %20, %21 : vector<16x32xf32>
    %cst_15 = arith.constant 0.000000e+00 : f32
    %23 = vector.broadcast %cst_15 : f32 to vector<16x32xf32>
    %24 = arith.maximumf %22, %23 : vector<16x32xf32>
    %c1 = arith.constant 1 : index
    %c0_16 = arith.constant 0 : index
    %25 = vector.load %arg5[%c1, %c0_16] : memref<8x128xf32, #tpu.memory_space<vmem>>, vector<1x128xf32>
    %c2 = arith.constant 2 : index
    %c0_17 = arith.constant 0 : index
    %26 = vector.load %arg5[%c2, %c0_17] : memref<8x128xf32, #tpu.memory_space<vmem>>, vector<1x128xf32>
    %c0_18 = arith.constant 0 : index
    %c0_19 = arith.constant 0 : index
    %c0_20 = arith.constant 0 : index
    %27 = vector.load %arg3[%c0_18, %c0_19, %c0_20] : memref<4x32x96xf32, #tpu.memory_space<vmem>>, vector<1x32x96xf32>
    %28 = vector.shape_cast %27 : vector<1x32x96xf32> to vector<32x96xf32>
    %cst_21 = arith.constant dense<0.000000e+00> : vector<16x96xf32>
    %29 = tpu.matmul %19, %28, %cst_21 {dimension_numbers = #tpu.dot_dimension_numbers<[1], [0], [0], [1], [0, 0, 1, 1], [], []>} : vector<16x32xf32>, vector<32x96xf32>, vector<16x96xf32> -> vector<16x96xf32>
    %30 = vector.extract_strided_slice %25 {offsets = [0, 0], sizes = [1, 96], strides = [1, 1]} : vector<1x128xf32> to vector<1x96xf32>
    %31 = vector.broadcast %30 : vector<1x96xf32> to vector<16x96xf32>
    %32 = arith.addf %29, %31 : vector<16x96xf32>
    %c1_22 = arith.constant 1 : index
    %c0_23 = arith.constant 0 : index
    %c0_24 = arith.constant 0 : index
    %33 = vector.load %arg3[%c1_22, %c0_23, %c0_24] : memref<4x32x96xf32, #tpu.memory_space<vmem>>, vector<1x32x96xf32>
    %34 = vector.shape_cast %33 : vector<1x32x96xf32> to vector<32x96xf32>
    %cst_25 = arith.constant dense<0.000000e+00> : vector<16x96xf32>
    %35 = tpu.matmul %24, %34, %cst_25 {dimension_numbers = #tpu.dot_dimension_numbers<[1], [0], [0], [1], [0, 0, 1, 1], [], []>} : vector<16x32xf32>, vector<32x96xf32>, vector<16x96xf32> -> vector<16x96xf32>
    %36 = vector.extract_strided_slice %26 {offsets = [0, 0], sizes = [1, 96], strides = [1, 1]} : vector<1x128xf32> to vector<1x96xf32>
    %37 = vector.broadcast %36 : vector<1x96xf32> to vector<16x96xf32>
    %38 = arith.addf %35, %37 : vector<16x96xf32>
    %39 = vector.extract_strided_slice %32 {offsets = [0, 0], sizes = [16, 32], strides = [1, 1]} : vector<16x96xf32> to vector<16x32xf32>
    %40 = vector.extract_strided_slice %38 {offsets = [0, 32], sizes = [16, 32], strides = [1, 1]} : vector<16x96xf32> to vector<16x32xf32>
    %41 = vector.extract_strided_slice %38 {offsets = [0, 64], sizes = [16, 32], strides = [1, 1]} : vector<16x96xf32> to vector<16x32xf32>
    %42 = vector.extract_strided_slice %39 {offsets = [0, 0], sizes = [16, 16], strides = [1, 1]} : vector<16x32xf32> to vector<16x16xf32>
    %43 = vector.extract_strided_slice %40 {offsets = [0, 0], sizes = [16, 16], strides = [1, 1]} : vector<16x32xf32> to vector<16x16xf32>
    %cst_26 = arith.constant dense<0.000000e+00> : vector<16x16xf32>
    %44 = tpu.matmul %42, %43, %cst_26 {dimension_numbers = #tpu.dot_dimension_numbers<[1], [1], [0], [0], [0, 0, 1, 0], [], []>} : vector<16x16xf32>, vector<16x16xf32>, vector<16x16xf32> -> vector<16x16xf32>
    %cst_27 = arith.constant 0.000000e+00 : f32
    %45 = vector.broadcast %cst_27 : f32 to vector<16x16xf32>
    %46 = arith.cmpf ogt, %0, %45 : vector<16x16xf32>
    %cst_28 = arith.constant -1.000000e+30 : f32
    %47 = vector.broadcast %cst_28 : f32 to vector<16x16xf32>
    %48 = arith.select %46, %44, %47 : vector<16x16xi1>, vector<16x16xf32>
    %cst_29 = arith.constant dense<0xFF800000> : vector<16xf32>
    %49 = vector.multi_reduction <maximumf>, %48, %cst_29 [1] : vector<16x16xf32> to vector<16xf32>
    %50 = vector.shape_cast %49 : vector<16xf32> to vector<16x1xf32>
    %51 = vector.broadcast %50 : vector<16x1xf32> to vector<16x16xf32>
    %52 = arith.subf %48, %51 : vector<16x16xf32>
    %53 = math.exp %52 : vector<16x16xf32>
    %54 = arith.mulf %53, %0 : vector<16x16xf32>
    %cst_30 = arith.constant dense<0.000000e+00> : vector<16xf32>
    %55 = vector.multi_reduction <add>, %54, %cst_30 [1] : vector<16x16xf32> to vector<16xf32>
    %56 = vector.shape_cast %55 : vector<16xf32> to vector<16x1xf32>
    %cst_31 = arith.constant 0.000000e+00 : f32
    %57 = vector.broadcast %cst_31 : f32 to vector<16x1xf32>
    %58 = arith.cmpf ogt, %56, %57 : vector<16x1xf32>
    %cst_32 = arith.constant 1.000000e+00 : f32
    %59 = vector.broadcast %cst_32 : f32 to vector<16x1xf32>
    %60 = arith.select %58, %56, %59 : vector<16x1xi1>, vector<16x1xf32>
    %61 = tpu.reciprocal %60 {approx = true} : vector<16x1xf32> -> vector<16x1xf32>
    %62 = vector.extract_strided_slice %41 {offsets = [0, 0], sizes = [16, 16], strides = [1, 1]} : vector<16x32xf32> to vector<16x16xf32>
    %cst_33 = arith.constant dense<0.000000e+00> : vector<16x16xf32>
    %63 = tpu.matmul %54, %62, %cst_33 {dimension_numbers = #tpu.dot_dimension_numbers<[1], [0], [0], [1], [0, 0, 1, 1], [], []>} : vector<16x16xf32>, vector<16x16xf32>, vector<16x16xf32> -> vector<16x16xf32>
    %64 = vector.broadcast %61 : vector<16x1xf32> to vector<16x16xf32>
    %65 = arith.mulf %63, %64 : vector<16x16xf32>
    %66 = vector.extract_strided_slice %39 {offsets = [0, 16], sizes = [16, 16], strides = [1, 1]} : vector<16x32xf32> to vector<16x16xf32>
    %67 = vector.extract_strided_slice %40 {offsets = [0, 16], sizes = [16, 16], strides = [1, 1]} : vector<16x32xf32> to vector<16x16xf32>
    %cst_34 = arith.constant dense<0.000000e+00> : vector<16x16xf32>
    %68 = tpu.matmul %66, %67, %cst_34 {dimension_numbers = #tpu.dot_dimension_numbers<[1], [1], [0], [0], [0, 0, 1, 0], [], []>} : vector<16x16xf32>, vector<16x16xf32>, vector<16x16xf32> -> vector<16x16xf32>
    %cst_35 = arith.constant 0.000000e+00 : f32
    %69 = vector.broadcast %cst_35 : f32 to vector<16x16xf32>
    %70 = arith.cmpf ogt, %0, %69 : vector<16x16xf32>
    %cst_36 = arith.constant -1.000000e+30 : f32
    %71 = vector.broadcast %cst_36 : f32 to vector<16x16xf32>
    %72 = arith.select %70, %68, %71 : vector<16x16xi1>, vector<16x16xf32>
    %cst_37 = arith.constant dense<0xFF800000> : vector<16xf32>
    %73 = vector.multi_reduction <maximumf>, %72, %cst_37 [1] : vector<16x16xf32> to vector<16xf32>
    %74 = vector.shape_cast %73 : vector<16xf32> to vector<16x1xf32>
    %75 = vector.broadcast %74 : vector<16x1xf32> to vector<16x16xf32>
    %76 = arith.subf %72, %75 : vector<16x16xf32>
    %77 = math.exp %76 : vector<16x16xf32>
    %78 = arith.mulf %77, %0 : vector<16x16xf32>
    %cst_38 = arith.constant dense<0.000000e+00> : vector<16xf32>
    %79 = vector.multi_reduction <add>, %78, %cst_38 [1] : vector<16x16xf32> to vector<16xf32>
    %80 = vector.shape_cast %79 : vector<16xf32> to vector<16x1xf32>
    %cst_39 = arith.constant 0.000000e+00 : f32
    %81 = vector.broadcast %cst_39 : f32 to vector<16x1xf32>
    %82 = arith.cmpf ogt, %80, %81 : vector<16x1xf32>
    %cst_40 = arith.constant 1.000000e+00 : f32
    %83 = vector.broadcast %cst_40 : f32 to vector<16x1xf32>
    %84 = arith.select %82, %80, %83 : vector<16x1xi1>, vector<16x1xf32>
    %85 = tpu.reciprocal %84 {approx = true} : vector<16x1xf32> -> vector<16x1xf32>
    %86 = vector.extract_strided_slice %41 {offsets = [0, 16], sizes = [16, 16], strides = [1, 1]} : vector<16x32xf32> to vector<16x16xf32>
    %cst_41 = arith.constant dense<0.000000e+00> : vector<16x16xf32>
    %87 = tpu.matmul %78, %86, %cst_41 {dimension_numbers = #tpu.dot_dimension_numbers<[1], [0], [0], [1], [0, 0, 1, 1], [], []>} : vector<16x16xf32>, vector<16x16xf32>, vector<16x16xf32> -> vector<16x16xf32>
    %88 = vector.broadcast %85 : vector<16x1xf32> to vector<16x16xf32>
    %89 = arith.mulf %87, %88 : vector<16x16xf32>
    %90 = tpu.concatenate %65, %89 in 1 : vector<16x16xf32>, vector<16x16xf32> -> vector<16x32xf32>
    %91 = vector.extract_strided_slice %38 {offsets = [0, 0], sizes = [16, 32], strides = [1, 1]} : vector<16x96xf32> to vector<16x32xf32>
    %92 = vector.extract_strided_slice %32 {offsets = [0, 32], sizes = [16, 32], strides = [1, 1]} : vector<16x96xf32> to vector<16x32xf32>
    %93 = vector.extract_strided_slice %32 {offsets = [0, 64], sizes = [16, 32], strides = [1, 1]} : vector<16x96xf32> to vector<16x32xf32>
    %94 = vector.extract_strided_slice %91 {offsets = [0, 0], sizes = [16, 16], strides = [1, 1]} : vector<16x32xf32> to vector<16x16xf32>
    %95 = vector.extract_strided_slice %92 {offsets = [0, 0], sizes = [16, 16], strides = [1, 1]} : vector<16x32xf32> to vector<16x16xf32>
    %cst_42 = arith.constant dense<0.000000e+00> : vector<16x16xf32>
    %96 = tpu.matmul %94, %95, %cst_42 {dimension_numbers = #tpu.dot_dimension_numbers<[1], [1], [0], [0], [0, 0, 1, 0], [], []>} : vector<16x16xf32>, vector<16x16xf32>, vector<16x16xf32> -> vector<16x16xf32>
    %cst_43 = arith.constant 0.000000e+00 : f32
    %97 = vector.broadcast %cst_43 : f32 to vector<16x16xf32>
    %98 = arith.cmpf ogt, %1, %97 : vector<16x16xf32>
    %cst_44 = arith.constant -1.000000e+30 : f32
    %99 = vector.broadcast %cst_44 : f32 to vector<16x16xf32>
    %100 = arith.select %98, %96, %99 : vector<16x16xi1>, vector<16x16xf32>
    %cst_45 = arith.constant dense<0xFF800000> : vector<16xf32>
    %101 = vector.multi_reduction <maximumf>, %100, %cst_45 [1] : vector<16x16xf32> to vector<16xf32>
    %102 = vector.shape_cast %101 : vector<16xf32> to vector<16x1xf32>
    %103 = vector.broadcast %102 : vector<16x1xf32> to vector<16x16xf32>
    %104 = arith.subf %100, %103 : vector<16x16xf32>
    %105 = math.exp %104 : vector<16x16xf32>
    %106 = arith.mulf %105, %1 : vector<16x16xf32>
    %cst_46 = arith.constant dense<0.000000e+00> : vector<16xf32>
    %107 = vector.multi_reduction <add>, %106, %cst_46 [1] : vector<16x16xf32> to vector<16xf32>
    %108 = vector.shape_cast %107 : vector<16xf32> to vector<16x1xf32>
    %cst_47 = arith.constant 0.000000e+00 : f32
    %109 = vector.broadcast %cst_47 : f32 to vector<16x1xf32>
    %110 = arith.cmpf ogt, %108, %109 : vector<16x1xf32>
    %cst_48 = arith.constant 1.000000e+00 : f32
    %111 = vector.broadcast %cst_48 : f32 to vector<16x1xf32>
    %112 = arith.select %110, %108, %111 : vector<16x1xi1>, vector<16x1xf32>
    %113 = tpu.reciprocal %112 {approx = true} : vector<16x1xf32> -> vector<16x1xf32>
    %114 = vector.extract_strided_slice %93 {offsets = [0, 0], sizes = [16, 16], strides = [1, 1]} : vector<16x32xf32> to vector<16x16xf32>
    %cst_49 = arith.constant dense<0.000000e+00> : vector<16x16xf32>
    %115 = tpu.matmul %106, %114, %cst_49 {dimension_numbers = #tpu.dot_dimension_numbers<[1], [0], [0], [1], [0, 0, 1, 1], [], []>} : vector<16x16xf32>, vector<16x16xf32>, vector<16x16xf32> -> vector<16x16xf32>
    %116 = vector.broadcast %113 : vector<16x1xf32> to vector<16x16xf32>
    %117 = arith.mulf %115, %116 : vector<16x16xf32>
    %118 = vector.extract_strided_slice %91 {offsets = [0, 16], sizes = [16, 16], strides = [1, 1]} : vector<16x32xf32> to vector<16x16xf32>
    %119 = vector.extract_strided_slice %92 {offsets = [0, 16], sizes = [16, 16], strides = [1, 1]} : vector<16x32xf32> to vector<16x16xf32>
    %cst_50 = arith.constant dense<0.000000e+00> : vector<16x16xf32>
    %120 = tpu.matmul %118, %119, %cst_50 {dimension_numbers = #tpu.dot_dimension_numbers<[1], [1], [0], [0], [0, 0, 1, 0], [], []>} : vector<16x16xf32>, vector<16x16xf32>, vector<16x16xf32> -> vector<16x16xf32>
    %cst_51 = arith.constant 0.000000e+00 : f32
    %121 = vector.broadcast %cst_51 : f32 to vector<16x16xf32>
    %122 = arith.cmpf ogt, %1, %121 : vector<16x16xf32>
    %cst_52 = arith.constant -1.000000e+30 : f32
    %123 = vector.broadcast %cst_52 : f32 to vector<16x16xf32>
    %124 = arith.select %122, %120, %123 : vector<16x16xi1>, vector<16x16xf32>
    %cst_53 = arith.constant dense<0xFF800000> : vector<16xf32>
    %125 = vector.multi_reduction <maximumf>, %124, %cst_53 [1] : vector<16x16xf32> to vector<16xf32>
    %126 = vector.shape_cast %125 : vector<16xf32> to vector<16x1xf32>
    %127 = vector.broadcast %126 : vector<16x1xf32> to vector<16x16xf32>
    %128 = arith.subf %124, %127 : vector<16x16xf32>
    %129 = math.exp %128 : vector<16x16xf32>
    %130 = arith.mulf %129, %1 : vector<16x16xf32>
    %cst_54 = arith.constant dense<0.000000e+00> : vector<16xf32>
    %131 = vector.multi_reduction <add>, %130, %cst_54 [1] : vector<16x16xf32> to vector<16xf32>
    %132 = vector.shape_cast %131 : vector<16xf32> to vector<16x1xf32>
    %cst_55 = arith.constant 0.000000e+00 : f32
    %133 = vector.broadcast %cst_55 : f32 to vector<16x1xf32>
    %134 = arith.cmpf ogt, %132, %133 : vector<16x1xf32>
    %cst_56 = arith.constant 1.000000e+00 : f32
    %135 = vector.broadcast %cst_56 : f32 to vector<16x1xf32>
    %136 = arith.select %134, %132, %135 : vector<16x1xi1>, vector<16x1xf32>
    %137 = tpu.reciprocal %136 {approx = true} : vector<16x1xf32> -> vector<16x1xf32>
    %138 = vector.extract_strided_slice %93 {offsets = [0, 16], sizes = [16, 16], strides = [1, 1]} : vector<16x32xf32> to vector<16x16xf32>
    %cst_57 = arith.constant dense<0.000000e+00> : vector<16x16xf32>
    %139 = tpu.matmul %130, %138, %cst_57 {dimension_numbers = #tpu.dot_dimension_numbers<[1], [0], [0], [1], [0, 0, 1, 1], [], []>} : vector<16x16xf32>, vector<16x16xf32>, vector<16x16xf32> -> vector<16x16xf32>
    %140 = vector.broadcast %137 : vector<16x1xf32> to vector<16x16xf32>
    %141 = arith.mulf %139, %140 : vector<16x16xf32>
    %142 = tpu.concatenate %117, %141 in 1 : vector<16x16xf32>, vector<16x16xf32> -> vector<16x32xf32>
    %cst_58 = arith.constant 5.000000e-01 : f32
    %143 = vector.broadcast %cst_58 : f32 to vector<16x32xf32>
    %144 = arith.mulf %143, %90 : vector<16x32xf32>
    %cst_59 = arith.constant 0.707106769 : f32
    %145 = vector.broadcast %cst_59 : f32 to vector<16x32xf32>
    %146 = arith.mulf %90, %145 : vector<16x32xf32>
    %147 = math.absf %146 : vector<16x32xf32>
    %cst_60 = arith.constant 0.327591091 : f32
    %148 = vector.broadcast %cst_60 : f32 to vector<16x32xf32>
    %149 = arith.mulf %148, %147 : vector<16x32xf32>
    %cst_61 = arith.constant 1.000000e+00 : f32
    %150 = vector.broadcast %cst_61 : f32 to vector<16x32xf32>
    %151 = arith.addf %150, %149 : vector<16x32xf32>
    %cst_62 = arith.constant 1.000000e+00 : f32
    %152 = vector.broadcast %cst_62 : f32 to vector<16x32xf32>
    %153 = arith.divf %152, %151 : vector<16x32xf32>
    %cst_63 = arith.constant 1.06140542 : f32
    %154 = vector.broadcast %cst_63 : f32 to vector<16x32xf32>
    %155 = arith.mulf %154, %153 : vector<16x32xf32>
    %cst_64 = arith.constant 1.45315206 : f32
    %156 = vector.broadcast %cst_64 : f32 to vector<16x32xf32>
    %157 = arith.subf %155, %156 : vector<16x32xf32>
    %158 = arith.mulf %157, %153 : vector<16x32xf32>
    %cst_65 = arith.constant 1.42141378 : f32
    %159 = vector.broadcast %cst_65 : f32 to vector<16x32xf32>
    %160 = arith.addf %158, %159 : vector<16x32xf32>
    %161 = arith.mulf %160, %153 : vector<16x32xf32>
    %cst_66 = arith.constant 0.284496725 : f32
    %162 = vector.broadcast %cst_66 : f32 to vector<16x32xf32>
    %163 = arith.subf %161, %162 : vector<16x32xf32>
    %164 = arith.mulf %163, %153 : vector<16x32xf32>
    %cst_67 = arith.constant 0.254829586 : f32
    %165 = vector.broadcast %cst_67 : f32 to vector<16x32xf32>
    %166 = arith.addf %164, %165 : vector<16x32xf32>
    %167 = arith.mulf %166, %153 : vector<16x32xf32>
    %168 = arith.mulf %147, %147 : vector<16x32xf32>
    %cst_68 = arith.constant 0.000000e+00 : f32
    %169 = vector.broadcast %cst_68 : f32 to vector<16x32xf32>
    %170 = arith.subf %169, %168 : vector<16x32xf32>
    %171 = math.exp %170 : vector<16x32xf32>
    %172 = arith.mulf %167, %171 : vector<16x32xf32>
    %cst_69 = arith.constant 1.000000e+00 : f32
    %173 = vector.broadcast %cst_69 : f32 to vector<16x32xf32>
    %174 = arith.subf %173, %172 : vector<16x32xf32>
    %cst_70 = arith.constant 0.000000e+00 : f32
    %175 = vector.broadcast %cst_70 : f32 to vector<16x32xf32>
    %176 = arith.cmpf olt, %146, %175 : vector<16x32xf32>
    %cst_71 = arith.constant 0.000000e+00 : f32
    %177 = vector.broadcast %cst_71 : f32 to vector<16x32xf32>
    %178 = arith.subf %177, %174 : vector<16x32xf32>
    %179 = arith.select %176, %178, %174 : vector<16x32xi1>, vector<16x32xf32>
    %cst_72 = arith.constant 1.000000e+00 : f32
    %180 = vector.broadcast %cst_72 : f32 to vector<16x32xf32>
    %181 = arith.addf %180, %179 : vector<16x32xf32>
    %182 = arith.mulf %144, %181 : vector<16x32xf32>
    %c0_73 = arith.constant 0 : index
    %c0_74 = arith.constant 0 : index
    %c0_75 = arith.constant 0 : index
    %183 = vector.load %arg4[%c0_73, %c0_74, %c0_75] : memref<4x32x32xf32, #tpu.memory_space<vmem>>, vector<1x32x32xf32>
    %184 = vector.shape_cast %183 : vector<1x32x32xf32> to vector<32x32xf32>
    %cst_76 = arith.constant dense<0.000000e+00> : vector<16x32xf32>
    %185 = tpu.matmul %182, %184, %cst_76 {dimension_numbers = #tpu.dot_dimension_numbers<[1], [0], [0], [1], [0, 0, 1, 1], [], []>} : vector<16x32xf32>, vector<32x32xf32>, vector<16x32xf32> -> vector<16x32xf32>
    %186 = vector.extract_strided_slice %25 {offsets = [0, 96], sizes = [1, 32], strides = [1, 1]} : vector<1x128xf32> to vector<1x32xf32>
    %187 = vector.broadcast %186 : vector<1x32xf32> to vector<16x32xf32>
    %188 = arith.addf %185, %187 : vector<16x32xf32>
    %cst_77 = arith.constant 5.000000e-01 : f32
    %189 = vector.broadcast %cst_77 : f32 to vector<16x32xf32>
    %190 = arith.mulf %189, %142 : vector<16x32xf32>
    %cst_78 = arith.constant 0.707106769 : f32
    %191 = vector.broadcast %cst_78 : f32 to vector<16x32xf32>
    %192 = arith.mulf %142, %191 : vector<16x32xf32>
    %193 = math.absf %192 : vector<16x32xf32>
    %cst_79 = arith.constant 0.327591091 : f32
    %194 = vector.broadcast %cst_79 : f32 to vector<16x32xf32>
    %195 = arith.mulf %194, %193 : vector<16x32xf32>
    %cst_80 = arith.constant 1.000000e+00 : f32
    %196 = vector.broadcast %cst_80 : f32 to vector<16x32xf32>
    %197 = arith.addf %196, %195 : vector<16x32xf32>
    %cst_81 = arith.constant 1.000000e+00 : f32
    %198 = vector.broadcast %cst_81 : f32 to vector<16x32xf32>
    %199 = arith.divf %198, %197 : vector<16x32xf32>
    %cst_82 = arith.constant 1.06140542 : f32
    %200 = vector.broadcast %cst_82 : f32 to vector<16x32xf32>
    %201 = arith.mulf %200, %199 : vector<16x32xf32>
    %cst_83 = arith.constant 1.45315206 : f32
    %202 = vector.broadcast %cst_83 : f32 to vector<16x32xf32>
    %203 = arith.subf %201, %202 : vector<16x32xf32>
    %204 = arith.mulf %203, %199 : vector<16x32xf32>
    %cst_84 = arith.constant 1.42141378 : f32
    %205 = vector.broadcast %cst_84 : f32 to vector<16x32xf32>
    %206 = arith.addf %204, %205 : vector<16x32xf32>
    %207 = arith.mulf %206, %199 : vector<16x32xf32>
    %cst_85 = arith.constant 0.284496725 : f32
    %208 = vector.broadcast %cst_85 : f32 to vector<16x32xf32>
    %209 = arith.subf %207, %208 : vector<16x32xf32>
    %210 = arith.mulf %209, %199 : vector<16x32xf32>
    %cst_86 = arith.constant 0.254829586 : f32
    %211 = vector.broadcast %cst_86 : f32 to vector<16x32xf32>
    %212 = arith.addf %210, %211 : vector<16x32xf32>
    %213 = arith.mulf %212, %199 : vector<16x32xf32>
    %214 = arith.mulf %193, %193 : vector<16x32xf32>
    %cst_87 = arith.constant 0.000000e+00 : f32
    %215 = vector.broadcast %cst_87 : f32 to vector<16x32xf32>
    %216 = arith.subf %215, %214 : vector<16x32xf32>
    %217 = math.exp %216 : vector<16x32xf32>
    %218 = arith.mulf %213, %217 : vector<16x32xf32>
    %cst_88 = arith.constant 1.000000e+00 : f32
    %219 = vector.broadcast %cst_88 : f32 to vector<16x32xf32>
    %220 = arith.subf %219, %218 : vector<16x32xf32>
    %cst_89 = arith.constant 0.000000e+00 : f32
    %221 = vector.broadcast %cst_89 : f32 to vector<16x32xf32>
    %222 = arith.cmpf olt, %192, %221 : vector<16x32xf32>
    %cst_90 = arith.constant 0.000000e+00 : f32
    %223 = vector.broadcast %cst_90 : f32 to vector<16x32xf32>
    %224 = arith.subf %223, %220 : vector<16x32xf32>
    %225 = arith.select %222, %224, %220 : vector<16x32xi1>, vector<16x32xf32>
    %cst_91 = arith.constant 1.000000e+00 : f32
    %226 = vector.broadcast %cst_91 : f32 to vector<16x32xf32>
    %227 = arith.addf %226, %225 : vector<16x32xf32>
    %228 = arith.mulf %190, %227 : vector<16x32xf32>
    %c1_92 = arith.constant 1 : index
    %c0_93 = arith.constant 0 : index
    %c0_94 = arith.constant 0 : index
    %229 = vector.load %arg4[%c1_92, %c0_93, %c0_94] : memref<4x32x32xf32, #tpu.memory_space<vmem>>, vector<1x32x32xf32>
    %230 = vector.shape_cast %229 : vector<1x32x32xf32> to vector<32x32xf32>
    %cst_95 = arith.constant dense<0.000000e+00> : vector<16x32xf32>
    %231 = tpu.matmul %228, %230, %cst_95 {dimension_numbers = #tpu.dot_dimension_numbers<[1], [0], [0], [1], [0, 0, 1, 1], [], []>} : vector<16x32xf32>, vector<32x32xf32>, vector<16x32xf32> -> vector<16x32xf32>
    %232 = vector.extract_strided_slice %26 {offsets = [0, 96], sizes = [1, 32], strides = [1, 1]} : vector<1x128xf32> to vector<1x32xf32>
    %233 = vector.broadcast %232 : vector<1x32xf32> to vector<16x32xf32>
    %234 = arith.addf %231, %233 : vector<16x32xf32>
    %cst_96 = arith.constant 0.268941432 : f32
    %235 = vector.broadcast %cst_96 : f32 to vector<16x32xf32>
    %236 = arith.mulf %235, %19 : vector<16x32xf32>
    %237 = arith.addf %188, %236 : vector<16x32xf32>
    %cst_97 = arith.constant 0.268941432 : f32
    %238 = vector.broadcast %cst_97 : f32 to vector<16x32xf32>
    %239 = arith.mulf %238, %24 : vector<16x32xf32>
    %240 = arith.addf %234, %239 : vector<16x32xf32>
    %c3 = arith.constant 3 : index
    %c0_98 = arith.constant 0 : index
    %241 = vector.load %arg5[%c3, %c0_98] : memref<8x128xf32, #tpu.memory_space<vmem>>, vector<1x128xf32>
    %c4 = arith.constant 4 : index
    %c0_99 = arith.constant 0 : index
    %242 = vector.load %arg5[%c4, %c0_99] : memref<8x128xf32, #tpu.memory_space<vmem>>, vector<1x128xf32>
    %c2_100 = arith.constant 2 : index
    %c0_101 = arith.constant 0 : index
    %c0_102 = arith.constant 0 : index
    %243 = vector.load %arg3[%c2_100, %c0_101, %c0_102] : memref<4x32x96xf32, #tpu.memory_space<vmem>>, vector<1x32x96xf32>
    %244 = vector.shape_cast %243 : vector<1x32x96xf32> to vector<32x96xf32>
    %cst_103 = arith.constant dense<0.000000e+00> : vector<16x96xf32>
    %245 = tpu.matmul %237, %244, %cst_103 {dimension_numbers = #tpu.dot_dimension_numbers<[1], [0], [0], [1], [0, 0, 1, 1], [], []>} : vector<16x32xf32>, vector<32x96xf32>, vector<16x96xf32> -> vector<16x96xf32>
    %246 = vector.extract_strided_slice %241 {offsets = [0, 0], sizes = [1, 96], strides = [1, 1]} : vector<1x128xf32> to vector<1x96xf32>
    %247 = vector.broadcast %246 : vector<1x96xf32> to vector<16x96xf32>
    %248 = arith.addf %245, %247 : vector<16x96xf32>
    %c3_104 = arith.constant 3 : index
    %c0_105 = arith.constant 0 : index
    %c0_106 = arith.constant 0 : index
    %249 = vector.load %arg3[%c3_104, %c0_105, %c0_106] : memref<4x32x96xf32, #tpu.memory_space<vmem>>, vector<1x32x96xf32>
    %250 = vector.shape_cast %249 : vector<1x32x96xf32> to vector<32x96xf32>
    %cst_107 = arith.constant dense<0.000000e+00> : vector<16x96xf32>
    %251 = tpu.matmul %240, %250, %cst_107 {dimension_numbers = #tpu.dot_dimension_numbers<[1], [0], [0], [1], [0, 0, 1, 1], [], []>} : vector<16x32xf32>, vector<32x96xf32>, vector<16x96xf32> -> vector<16x96xf32>
    %252 = vector.extract_strided_slice %242 {offsets = [0, 0], sizes = [1, 96], strides = [1, 1]} : vector<1x128xf32> to vector<1x96xf32>
    %253 = vector.broadcast %252 : vector<1x96xf32> to vector<16x96xf32>
    %254 = arith.addf %251, %253 : vector<16x96xf32>
    %255 = vector.extract_strided_slice %248 {offsets = [0, 0], sizes = [16, 32], strides = [1, 1]} : vector<16x96xf32> to vector<16x32xf32>
    %256 = vector.extract_strided_slice %254 {offsets = [0, 32], sizes = [16, 32], strides = [1, 1]} : vector<16x96xf32> to vector<16x32xf32>
    %257 = vector.extract_strided_slice %254 {offsets = [0, 64], sizes = [16, 32], strides = [1, 1]} : vector<16x96xf32> to vector<16x32xf32>
    %258 = vector.extract_strided_slice %255 {offsets = [0, 0], sizes = [16, 16], strides = [1, 1]} : vector<16x32xf32> to vector<16x16xf32>
    %259 = vector.extract_strided_slice %256 {offsets = [0, 0], sizes = [16, 16], strides = [1, 1]} : vector<16x32xf32> to vector<16x16xf32>
    %cst_108 = arith.constant dense<0.000000e+00> : vector<16x16xf32>
    %260 = tpu.matmul %258, %259, %cst_108 {dimension_numbers = #tpu.dot_dimension_numbers<[1], [1], [0], [0], [0, 0, 1, 0], [], []>} : vector<16x16xf32>, vector<16x16xf32>, vector<16x16xf32> -> vector<16x16xf32>
    %cst_109 = arith.constant 0.000000e+00 : f32
    %261 = vector.broadcast %cst_109 : f32 to vector<16x16xf32>
    %262 = arith.cmpf ogt, %0, %261 : vector<16x16xf32>
    %cst_110 = arith.constant -1.000000e+30 : f32
    %263 = vector.broadcast %cst_110 : f32 to vector<16x16xf32>
    %264 = arith.select %262, %260, %263 : vector<16x16xi1>, vector<16x16xf32>
    %cst_111 = arith.constant dense<0xFF800000> : vector<16xf32>
    %265 = vector.multi_reduction <maximumf>, %264, %cst_111 [1] : vector<16x16xf32> to vector<16xf32>
    %266 = vector.shape_cast %265 : vector<16xf32> to vector<16x1xf32>
    %267 = vector.broadcast %266 : vector<16x1xf32> to vector<16x16xf32>
    %268 = arith.subf %264, %267 : vector<16x16xf32>
    %269 = math.exp %268 : vector<16x16xf32>
    %270 = arith.mulf %269, %0 : vector<16x16xf32>
    %cst_112 = arith.constant dense<0.000000e+00> : vector<16xf32>
    %271 = vector.multi_reduction <add>, %270, %cst_112 [1] : vector<16x16xf32> to vector<16xf32>
    %272 = vector.shape_cast %271 : vector<16xf32> to vector<16x1xf32>
    %cst_113 = arith.constant 0.000000e+00 : f32
    %273 = vector.broadcast %cst_113 : f32 to vector<16x1xf32>
    %274 = arith.cmpf ogt, %272, %273 : vector<16x1xf32>
    %cst_114 = arith.constant 1.000000e+00 : f32
    %275 = vector.broadcast %cst_114 : f32 to vector<16x1xf32>
    %276 = arith.select %274, %272, %275 : vector<16x1xi1>, vector<16x1xf32>
    %277 = tpu.reciprocal %276 {approx = true} : vector<16x1xf32> -> vector<16x1xf32>
    %278 = vector.extract_strided_slice %257 {offsets = [0, 0], sizes = [16, 16], strides = [1, 1]} : vector<16x32xf32> to vector<16x16xf32>
    %cst_115 = arith.constant dense<0.000000e+00> : vector<16x16xf32>
    %279 = tpu.matmul %270, %278, %cst_115 {dimension_numbers = #tpu.dot_dimension_numbers<[1], [0], [0], [1], [0, 0, 1, 1], [], []>} : vector<16x16xf32>, vector<16x16xf32>, vector<16x16xf32> -> vector<16x16xf32>
    %280 = vector.broadcast %277 : vector<16x1xf32> to vector<16x16xf32>
    %281 = arith.mulf %279, %280 : vector<16x16xf32>
    %282 = vector.extract_strided_slice %255 {offsets = [0, 16], sizes = [16, 16], strides = [1, 1]} : vector<16x32xf32> to vector<16x16xf32>
    %283 = vector.extract_strided_slice %256 {offsets = [0, 16], sizes = [16, 16], strides = [1, 1]} : vector<16x32xf32> to vector<16x16xf32>
    %cst_116 = arith.constant dense<0.000000e+00> : vector<16x16xf32>
    %284 = tpu.matmul %282, %283, %cst_116 {dimension_numbers = #tpu.dot_dimension_numbers<[1], [1], [0], [0], [0, 0, 1, 0], [], []>} : vector<16x16xf32>, vector<16x16xf32>, vector<16x16xf32> -> vector<16x16xf32>
    %cst_117 = arith.constant 0.000000e+00 : f32
    %285 = vector.broadcast %cst_117 : f32 to vector<16x16xf32>
    %286 = arith.cmpf ogt, %0, %285 : vector<16x16xf32>
    %cst_118 = arith.constant -1.000000e+30 : f32
    %287 = vector.broadcast %cst_118 : f32 to vector<16x16xf32>
    %288 = arith.select %286, %284, %287 : vector<16x16xi1>, vector<16x16xf32>
    %cst_119 = arith.constant dense<0xFF800000> : vector<16xf32>
    %289 = vector.multi_reduction <maximumf>, %288, %cst_119 [1] : vector<16x16xf32> to vector<16xf32>
    %290 = vector.shape_cast %289 : vector<16xf32> to vector<16x1xf32>
    %291 = vector.broadcast %290 : vector<16x1xf32> to vector<16x16xf32>
    %292 = arith.subf %288, %291 : vector<16x16xf32>
    %293 = math.exp %292 : vector<16x16xf32>
    %294 = arith.mulf %293, %0 : vector<16x16xf32>
    %cst_120 = arith.constant dense<0.000000e+00> : vector<16xf32>
    %295 = vector.multi_reduction <add>, %294, %cst_120 [1] : vector<16x16xf32> to vector<16xf32>
    %296 = vector.shape_cast %295 : vector<16xf32> to vector<16x1xf32>
    %cst_121 = arith.constant 0.000000e+00 : f32
    %297 = vector.broadcast %cst_121 : f32 to vector<16x1xf32>
    %298 = arith.cmpf ogt, %296, %297 : vector<16x1xf32>
    %cst_122 = arith.constant 1.000000e+00 : f32
    %299 = vector.broadcast %cst_122 : f32 to vector<16x1xf32>
    %300 = arith.select %298, %296, %299 : vector<16x1xi1>, vector<16x1xf32>
    %301 = tpu.reciprocal %300 {approx = true} : vector<16x1xf32> -> vector<16x1xf32>
    %302 = vector.extract_strided_slice %257 {offsets = [0, 16], sizes = [16, 16], strides = [1, 1]} : vector<16x32xf32> to vector<16x16xf32>
    %cst_123 = arith.constant dense<0.000000e+00> : vector<16x16xf32>
    %303 = tpu.matmul %294, %302, %cst_123 {dimension_numbers = #tpu.dot_dimension_numbers<[1], [0], [0], [1], [0, 0, 1, 1], [], []>} : vector<16x16xf32>, vector<16x16xf32>, vector<16x16xf32> -> vector<16x16xf32>
    %304 = vector.broadcast %301 : vector<16x1xf32> to vector<16x16xf32>
    %305 = arith.mulf %303, %304 : vector<16x16xf32>
    %306 = tpu.concatenate %281, %305 in 1 : vector<16x16xf32>, vector<16x16xf32> -> vector<16x32xf32>
    %307 = vector.extract_strided_slice %254 {offsets = [0, 0], sizes = [16, 32], strides = [1, 1]} : vector<16x96xf32> to vector<16x32xf32>
    %308 = vector.extract_strided_slice %248 {offsets = [0, 32], sizes = [16, 32], strides = [1, 1]} : vector<16x96xf32> to vector<16x32xf32>
    %309 = vector.extract_strided_slice %248 {offsets = [0, 64], sizes = [16, 32], strides = [1, 1]} : vector<16x96xf32> to vector<16x32xf32>
    %310 = vector.extract_strided_slice %307 {offsets = [0, 0], sizes = [16, 16], strides = [1, 1]} : vector<16x32xf32> to vector<16x16xf32>
    %311 = vector.extract_strided_slice %308 {offsets = [0, 0], sizes = [16, 16], strides = [1, 1]} : vector<16x32xf32> to vector<16x16xf32>
    %cst_124 = arith.constant dense<0.000000e+00> : vector<16x16xf32>
    %312 = tpu.matmul %310, %311, %cst_124 {dimension_numbers = #tpu.dot_dimension_numbers<[1], [1], [0], [0], [0, 0, 1, 0], [], []>} : vector<16x16xf32>, vector<16x16xf32>, vector<16x16xf32> -> vector<16x16xf32>
    %cst_125 = arith.constant 0.000000e+00 : f32
    %313 = vector.broadcast %cst_125 : f32 to vector<16x16xf32>
    %314 = arith.cmpf ogt, %1, %313 : vector<16x16xf32>
    %cst_126 = arith.constant -1.000000e+30 : f32
    %315 = vector.broadcast %cst_126 : f32 to vector<16x16xf32>
    %316 = arith.select %314, %312, %315 : vector<16x16xi1>, vector<16x16xf32>
    %cst_127 = arith.constant dense<0xFF800000> : vector<16xf32>
    %317 = vector.multi_reduction <maximumf>, %316, %cst_127 [1] : vector<16x16xf32> to vector<16xf32>
    %318 = vector.shape_cast %317 : vector<16xf32> to vector<16x1xf32>
    %319 = vector.broadcast %318 : vector<16x1xf32> to vector<16x16xf32>
    %320 = arith.subf %316, %319 : vector<16x16xf32>
    %321 = math.exp %320 : vector<16x16xf32>
    %322 = arith.mulf %321, %1 : vector<16x16xf32>
    %cst_128 = arith.constant dense<0.000000e+00> : vector<16xf32>
    %323 = vector.multi_reduction <add>, %322, %cst_128 [1] : vector<16x16xf32> to vector<16xf32>
    %324 = vector.shape_cast %323 : vector<16xf32> to vector<16x1xf32>
    %cst_129 = arith.constant 0.000000e+00 : f32
    %325 = vector.broadcast %cst_129 : f32 to vector<16x1xf32>
    %326 = arith.cmpf ogt, %324, %325 : vector<16x1xf32>
    %cst_130 = arith.constant 1.000000e+00 : f32
    %327 = vector.broadcast %cst_130 : f32 to vector<16x1xf32>
    %328 = arith.select %326, %324, %327 : vector<16x1xi1>, vector<16x1xf32>
    %329 = tpu.reciprocal %328 {approx = true} : vector<16x1xf32> -> vector<16x1xf32>
    %330 = vector.extract_strided_slice %309 {offsets = [0, 0], sizes = [16, 16], strides = [1, 1]} : vector<16x32xf32> to vector<16x16xf32>
    %cst_131 = arith.constant dense<0.000000e+00> : vector<16x16xf32>
    %331 = tpu.matmul %322, %330, %cst_131 {dimension_numbers = #tpu.dot_dimension_numbers<[1], [0], [0], [1], [0, 0, 1, 1], [], []>} : vector<16x16xf32>, vector<16x16xf32>, vector<16x16xf32> -> vector<16x16xf32>
    %332 = vector.broadcast %329 : vector<16x1xf32> to vector<16x16xf32>
    %333 = arith.mulf %331, %332 : vector<16x16xf32>
    %334 = vector.extract_strided_slice %307 {offsets = [0, 16], sizes = [16, 16], strides = [1, 1]} : vector<16x32xf32> to vector<16x16xf32>
    %335 = vector.extract_strided_slice %308 {offsets = [0, 16], sizes = [16, 16], strides = [1, 1]} : vector<16x32xf32> to vector<16x16xf32>
    %cst_132 = arith.constant dense<0.000000e+00> : vector<16x16xf32>
    %336 = tpu.matmul %334, %335, %cst_132 {dimension_numbers = #tpu.dot_dimension_numbers<[1], [1], [0], [0], [0, 0, 1, 0], [], []>} : vector<16x16xf32>, vector<16x16xf32>, vector<16x16xf32> -> vector<16x16xf32>
    %cst_133 = arith.constant 0.000000e+00 : f32
    %337 = vector.broadcast %cst_133 : f32 to vector<16x16xf32>
    %338 = arith.cmpf ogt, %1, %337 : vector<16x16xf32>
    %cst_134 = arith.constant -1.000000e+30 : f32
    %339 = vector.broadcast %cst_134 : f32 to vector<16x16xf32>
    %340 = arith.select %338, %336, %339 : vector<16x16xi1>, vector<16x16xf32>
    %cst_135 = arith.constant dense<0xFF800000> : vector<16xf32>
    %341 = vector.multi_reduction <maximumf>, %340, %cst_135 [1] : vector<16x16xf32> to vector<16xf32>
    %342 = vector.shape_cast %341 : vector<16xf32> to vector<16x1xf32>
    %343 = vector.broadcast %342 : vector<16x1xf32> to vector<16x16xf32>
    %344 = arith.subf %340, %343 : vector<16x16xf32>
    %345 = math.exp %344 : vector<16x16xf32>
    %346 = arith.mulf %345, %1 : vector<16x16xf32>
    %cst_136 = arith.constant dense<0.000000e+00> : vector<16xf32>
    %347 = vector.multi_reduction <add>, %346, %cst_136 [1] : vector<16x16xf32> to vector<16xf32>
    %348 = vector.shape_cast %347 : vector<16xf32> to vector<16x1xf32>
    %cst_137 = arith.constant 0.000000e+00 : f32
    %349 = vector.broadcast %cst_137 : f32 to vector<16x1xf32>
    %350 = arith.cmpf ogt, %348, %349 : vector<16x1xf32>
    %cst_138 = arith.constant 1.000000e+00 : f32
    %351 = vector.broadcast %cst_138 : f32 to vector<16x1xf32>
    %352 = arith.select %350, %348, %351 : vector<16x1xi1>, vector<16x1xf32>
    %353 = tpu.reciprocal %352 {approx = true} : vector<16x1xf32> -> vector<16x1xf32>
    %354 = vector.extract_strided_slice %309 {offsets = [0, 16], sizes = [16, 16], strides = [1, 1]} : vector<16x32xf32> to vector<16x16xf32>
    %cst_139 = arith.constant dense<0.000000e+00> : vector<16x16xf32>
    %355 = tpu.matmul %346, %354, %cst_139 {dimension_numbers = #tpu.dot_dimension_numbers<[1], [0], [0], [1], [0, 0, 1, 1], [], []>} : vector<16x16xf32>, vector<16x16xf32>, vector<16x16xf32> -> vector<16x16xf32>
    %356 = vector.broadcast %353 : vector<16x1xf32> to vector<16x16xf32>
    %357 = arith.mulf %355, %356 : vector<16x16xf32>
    %358 = tpu.concatenate %333, %357 in 1 : vector<16x16xf32>, vector<16x16xf32> -> vector<16x32xf32>
    %cst_140 = arith.constant 5.000000e-01 : f32
    %359 = vector.broadcast %cst_140 : f32 to vector<16x32xf32>
    %360 = arith.mulf %359, %306 : vector<16x32xf32>
    %cst_141 = arith.constant 0.707106769 : f32
    %361 = vector.broadcast %cst_141 : f32 to vector<16x32xf32>
    %362 = arith.mulf %306, %361 : vector<16x32xf32>
    %363 = math.absf %362 : vector<16x32xf32>
    %cst_142 = arith.constant 0.327591091 : f32
    %364 = vector.broadcast %cst_142 : f32 to vector<16x32xf32>
    %365 = arith.mulf %364, %363 : vector<16x32xf32>
    %cst_143 = arith.constant 1.000000e+00 : f32
    %366 = vector.broadcast %cst_143 : f32 to vector<16x32xf32>
    %367 = arith.addf %366, %365 : vector<16x32xf32>
    %cst_144 = arith.constant 1.000000e+00 : f32
    %368 = vector.broadcast %cst_144 : f32 to vector<16x32xf32>
    %369 = arith.divf %368, %367 : vector<16x32xf32>
    %cst_145 = arith.constant 1.06140542 : f32
    %370 = vector.broadcast %cst_145 : f32 to vector<16x32xf32>
    %371 = arith.mulf %370, %369 : vector<16x32xf32>
    %cst_146 = arith.constant 1.45315206 : f32
    %372 = vector.broadcast %cst_146 : f32 to vector<16x32xf32>
    %373 = arith.subf %371, %372 : vector<16x32xf32>
    %374 = arith.mulf %373, %369 : vector<16x32xf32>
    %cst_147 = arith.constant 1.42141378 : f32
    %375 = vector.broadcast %cst_147 : f32 to vector<16x32xf32>
    %376 = arith.addf %374, %375 : vector<16x32xf32>
    %377 = arith.mulf %376, %369 : vector<16x32xf32>
    %cst_148 = arith.constant 0.284496725 : f32
    %378 = vector.broadcast %cst_148 : f32 to vector<16x32xf32>
    %379 = arith.subf %377, %378 : vector<16x32xf32>
    %380 = arith.mulf %379, %369 : vector<16x32xf32>
    %cst_149 = arith.constant 0.254829586 : f32
    %381 = vector.broadcast %cst_149 : f32 to vector<16x32xf32>
    %382 = arith.addf %380, %381 : vector<16x32xf32>
    %383 = arith.mulf %382, %369 : vector<16x32xf32>
    %384 = arith.mulf %363, %363 : vector<16x32xf32>
    %cst_150 = arith.constant 0.000000e+00 : f32
    %385 = vector.broadcast %cst_150 : f32 to vector<16x32xf32>
    %386 = arith.subf %385, %384 : vector<16x32xf32>
    %387 = math.exp %386 : vector<16x32xf32>
    %388 = arith.mulf %383, %387 : vector<16x32xf32>
    %cst_151 = arith.constant 1.000000e+00 : f32
    %389 = vector.broadcast %cst_151 : f32 to vector<16x32xf32>
    %390 = arith.subf %389, %388 : vector<16x32xf32>
    %cst_152 = arith.constant 0.000000e+00 : f32
    %391 = vector.broadcast %cst_152 : f32 to vector<16x32xf32>
    %392 = arith.cmpf olt, %362, %391 : vector<16x32xf32>
    %cst_153 = arith.constant 0.000000e+00 : f32
    %393 = vector.broadcast %cst_153 : f32 to vector<16x32xf32>
    %394 = arith.subf %393, %390 : vector<16x32xf32>
    %395 = arith.select %392, %394, %390 : vector<16x32xi1>, vector<16x32xf32>
    %cst_154 = arith.constant 1.000000e+00 : f32
    %396 = vector.broadcast %cst_154 : f32 to vector<16x32xf32>
    %397 = arith.addf %396, %395 : vector<16x32xf32>
    %398 = arith.mulf %360, %397 : vector<16x32xf32>
    %c2_155 = arith.constant 2 : index
    %c0_156 = arith.constant 0 : index
    %c0_157 = arith.constant 0 : index
    %399 = vector.load %arg4[%c2_155, %c0_156, %c0_157] : memref<4x32x32xf32, #tpu.memory_space<vmem>>, vector<1x32x32xf32>
    %400 = vector.shape_cast %399 : vector<1x32x32xf32> to vector<32x32xf32>
    %cst_158 = arith.constant dense<0.000000e+00> : vector<16x32xf32>
    %401 = tpu.matmul %398, %400, %cst_158 {dimension_numbers = #tpu.dot_dimension_numbers<[1], [0], [0], [1], [0, 0, 1, 1], [], []>} : vector<16x32xf32>, vector<32x32xf32>, vector<16x32xf32> -> vector<16x32xf32>
    %402 = vector.extract_strided_slice %241 {offsets = [0, 96], sizes = [1, 32], strides = [1, 1]} : vector<1x128xf32> to vector<1x32xf32>
    %403 = vector.broadcast %402 : vector<1x32xf32> to vector<16x32xf32>
    %404 = arith.addf %401, %403 : vector<16x32xf32>
    %cst_159 = arith.constant 5.000000e-01 : f32
    %405 = vector.broadcast %cst_159 : f32 to vector<16x32xf32>
    %406 = arith.mulf %405, %358 : vector<16x32xf32>
    %cst_160 = arith.constant 0.707106769 : f32
    %407 = vector.broadcast %cst_160 : f32 to vector<16x32xf32>
    %408 = arith.mulf %358, %407 : vector<16x32xf32>
    %409 = math.absf %408 : vector<16x32xf32>
    %cst_161 = arith.constant 0.327591091 : f32
    %410 = vector.broadcast %cst_161 : f32 to vector<16x32xf32>
    %411 = arith.mulf %410, %409 : vector<16x32xf32>
    %cst_162 = arith.constant 1.000000e+00 : f32
    %412 = vector.broadcast %cst_162 : f32 to vector<16x32xf32>
    %413 = arith.addf %412, %411 : vector<16x32xf32>
    %cst_163 = arith.constant 1.000000e+00 : f32
    %414 = vector.broadcast %cst_163 : f32 to vector<16x32xf32>
    %415 = arith.divf %414, %413 : vector<16x32xf32>
    %cst_164 = arith.constant 1.06140542 : f32
    %416 = vector.broadcast %cst_164 : f32 to vector<16x32xf32>
    %417 = arith.mulf %416, %415 : vector<16x32xf32>
    %cst_165 = arith.constant 1.45315206 : f32
    %418 = vector.broadcast %cst_165 : f32 to vector<16x32xf32>
    %419 = arith.subf %417, %418 : vector<16x32xf32>
    %420 = arith.mulf %419, %415 : vector<16x32xf32>
    %cst_166 = arith.constant 1.42141378 : f32
    %421 = vector.broadcast %cst_166 : f32 to vector<16x32xf32>
    %422 = arith.addf %420, %421 : vector<16x32xf32>
    %423 = arith.mulf %422, %415 : vector<16x32xf32>
    %cst_167 = arith.constant 0.284496725 : f32
    %424 = vector.broadcast %cst_167 : f32 to vector<16x32xf32>
    %425 = arith.subf %423, %424 : vector<16x32xf32>
    %426 = arith.mulf %425, %415 : vector<16x32xf32>
    %cst_168 = arith.constant 0.254829586 : f32
    %427 = vector.broadcast %cst_168 : f32 to vector<16x32xf32>
    %428 = arith.addf %426, %427 : vector<16x32xf32>
    %429 = arith.mulf %428, %415 : vector<16x32xf32>
    %430 = arith.mulf %409, %409 : vector<16x32xf32>
    %cst_169 = arith.constant 0.000000e+00 : f32
    %431 = vector.broadcast %cst_169 : f32 to vector<16x32xf32>
    %432 = arith.subf %431, %430 : vector<16x32xf32>
    %433 = math.exp %432 : vector<16x32xf32>
    %434 = arith.mulf %429, %433 : vector<16x32xf32>
    %cst_170 = arith.constant 1.000000e+00 : f32
    %435 = vector.broadcast %cst_170 : f32 to vector<16x32xf32>
    %436 = arith.subf %435, %434 : vector<16x32xf32>
    %cst_171 = arith.constant 0.000000e+00 : f32
    %437 = vector.broadcast %cst_171 : f32 to vector<16x32xf32>
    %438 = arith.cmpf olt, %408, %437 : vector<16x32xf32>
    %cst_172 = arith.constant 0.000000e+00 : f32
    %439 = vector.broadcast %cst_172 : f32 to vector<16x32xf32>
    %440 = arith.subf %439, %436 : vector<16x32xf32>
    %441 = arith.select %438, %440, %436 : vector<16x32xi1>, vector<16x32xf32>
    %cst_173 = arith.constant 1.000000e+00 : f32
    %442 = vector.broadcast %cst_173 : f32 to vector<16x32xf32>
    %443 = arith.addf %442, %441 : vector<16x32xf32>
    %444 = arith.mulf %406, %443 : vector<16x32xf32>
    %c3_174 = arith.constant 3 : index
    %c0_175 = arith.constant 0 : index
    %c0_176 = arith.constant 0 : index
    %445 = vector.load %arg4[%c3_174, %c0_175, %c0_176] : memref<4x32x32xf32, #tpu.memory_space<vmem>>, vector<1x32x32xf32>
    %446 = vector.shape_cast %445 : vector<1x32x32xf32> to vector<32x32xf32>
    %cst_177 = arith.constant dense<0.000000e+00> : vector<16x32xf32>
    %447 = tpu.matmul %444, %446, %cst_177 {dimension_numbers = #tpu.dot_dimension_numbers<[1], [0], [0], [1], [0, 0, 1, 1], [], []>} : vector<16x32xf32>, vector<32x32xf32>, vector<16x32xf32> -> vector<16x32xf32>
    %448 = vector.extract_strided_slice %242 {offsets = [0, 96], sizes = [1, 32], strides = [1, 1]} : vector<1x128xf32> to vector<1x32xf32>
    %449 = vector.broadcast %448 : vector<1x32xf32> to vector<16x32xf32>
    %450 = arith.addf %447, %449 : vector<16x32xf32>
    %cst_178 = arith.constant 0.268941432 : f32
    %451 = vector.broadcast %cst_178 : f32 to vector<16x32xf32>
    %452 = arith.mulf %451, %237 : vector<16x32xf32>
    %453 = arith.addf %404, %452 : vector<16x32xf32>
    %cst_179 = arith.constant 0.268941432 : f32
    %454 = vector.broadcast %cst_179 : f32 to vector<16x32xf32>
    %455 = arith.mulf %454, %240 : vector<16x32xf32>
    %456 = arith.addf %450, %455 : vector<16x32xf32>
    %cst_180 = arith.constant dense<0.000000e+00> : vector<8x32xf32>
    %457 = tpu.matmul %2, %453, %cst_180 {dimension_numbers = #tpu.dot_dimension_numbers<[1], [0], [0], [1], [0, 0, 1, 1], [], []>} : vector<8x16xf32>, vector<16x32xf32>, vector<8x32xf32> -> vector<8x32xf32>
    %cst_181 = arith.constant dense<0.000000e+00> : vector<8x32xf32>
    %458 = tpu.matmul %3, %456, %cst_181 {dimension_numbers = #tpu.dot_dimension_numbers<[1], [0], [0], [1], [0, 0, 1, 1], [], []>} : vector<8x16xf32>, vector<16x32xf32>, vector<8x32xf32> -> vector<8x32xf32>
    %cst_182 = arith.constant dense<0.000000e+00> : vector<8x32xf32>
    %459 = tpu.matmul %457, %5, %cst_182 {dimension_numbers = #tpu.dot_dimension_numbers<[1], [0], [0], [1], [0, 0, 1, 1], [], []>} : vector<8x32xf32>, vector<32x32xf32>, vector<8x32xf32> -> vector<8x32xf32>
    %cst_183 = arith.constant dense<0.000000e+00> : vector<8x32xf32>
    %460 = tpu.matmul %458, %6, %cst_183 {dimension_numbers = #tpu.dot_dimension_numbers<[1], [0], [0], [1], [0, 0, 1, 1], [], []>} : vector<8x32xf32>, vector<32x32xf32>, vector<8x32xf32> -> vector<8x32xf32>
    %461 = arith.addf %459, %460 : vector<8x32xf32>
    %462 = vector.broadcast %11 : vector<1x32xf32> to vector<8x32xf32>
    %463 = arith.addf %461, %462 : vector<8x32xf32>
    %cst_184 = arith.constant 0.000000e+00 : f32
    %464 = vector.broadcast %cst_184 : f32 to vector<8x32xf32>
    %465 = arith.maximumf %463, %464 : vector<8x32xf32>
    %cst_185 = arith.constant dense<0.000000e+00> : vector<8x1xf32>
    %466 = tpu.matmul %465, %7, %cst_185 {dimension_numbers = #tpu.dot_dimension_numbers<[1], [0], [0], [1], [0, 0, 1, 1], [], []>} : vector<8x32xf32>, vector<32x1xf32>, vector<8x1xf32> -> vector<8x1xf32>
    %467 = vector.broadcast %12 : vector<1x1xf32> to vector<8x1xf32>
    %468 = arith.addf %466, %467 : vector<8x1xf32>
    %c0_186 = arith.constant 0 : index
    %c0_187 = arith.constant 0 : index
    %469 = vector.load %arg6[%c0_186, %c0_187] : memref<40x32xf32, #tpu.memory_space<vmem>>, vector<16x32xf32>
    tpu.vector_store %arg6[%c0_186, %c0_187], %453 {strides = array<i32>} : memref<40x32xf32, #tpu.memory_space<vmem>>, vector<16x32xf32>,
    %c16_188 = arith.constant 16 : index
    %c0_189 = arith.constant 0 : index
    %470 = vector.load %arg6[%c16_188, %c0_189] : memref<40x32xf32, #tpu.memory_space<vmem>>, vector<16x32xf32>
    tpu.vector_store %arg6[%c16_188, %c0_189], %456 {strides = array<i32>} : memref<40x32xf32, #tpu.memory_space<vmem>>, vector<16x32xf32>,
    %471 = vector.shape_cast %468 : vector<8x1xf32> to vector<8x1xf32>
    %472 = vector.broadcast %471 : vector<8x1xf32> to vector<8x32xf32>
    %c32_190 = arith.constant 32 : index
    %c0_191 = arith.constant 0 : index
    %473 = vector.load %arg6[%c32_190, %c0_191] : memref<40x32xf32, #tpu.memory_space<vmem>>, vector<8x32xf32>
    tpu.vector_store %arg6[%c32_190, %c0_191], %472 {strides = array<i32>} : memref<40x32xf32, #tpu.memory_space<vmem>>, vector<8x32xf32>,
    return
  }
}

</mosaic_0001>

<bundles_post_ra>
// kernel: tpu_custom_call.1
= control target key start
LH: loop header
LB: loop body
LE: loop exit
PB: predicated region body
PF: predicated region fallthrough
CT: control target
= control target key end

     0   :  { %11 = vsyncpa [#allocation3], 0  ;;  %s2044_s24 = smov [#allocation2]   ;;  %s2045_s26 = smov 128   ;;  %s2723_s0 = inlined_call_operand.vmem [shape: f32[32,32], index: 0, kind: input, shape index: {}]   ;;  %s2724_s1 = inlined_call_operand.vmem [shape: f32[48,16], index: 1, kind: input, shape index: {}]   ;;  %s2725_s2 = inlined_call_operand.vmem [shape: f32[128,32], index: 2, kind: input, shape index: {}]   ;;  %s2726_s3 = inlined_call_operand.vmem [shape: f32[4,32,96], index: 3, kind: input, shape index: {}]   ;;  %s2727_s4 = inlined_call_operand.hbm [shape: f32[4,32,32], index: 4, kind: input, shape index: {}]   ;;  %s2728_s5 = inlined_call_operand.vmem [shape: f32[8,128], index: 5, kind: input, shape index: {}]   ;;  %s2729_s6 = inlined_call_operand.vmem [shape: f32[40,32], index: 6, kind: output, shape index: {}]  }
   0x1   :  { %s24_s23 = sshll.u32 %s2727_s4, 4  ;;  %s26_s25 = sshll.u32 %s2044_s24, 4  ;;  %s25_s23 = int_to_ptr.hbm [resolvable:$true] %s24_s23  ;;  %s27_s25 = int_to_ptr.vmem [resolvable:$true] %s26_s25 }
   0x2   :  { %s2046_s27 = smov 8  }
   0x3   :  { %32 = dma.hbm_to_vmem [thread:$0]  %s25_s23, 2048, %s27_s25, [#allocation3], %s2045_s26, %s2045_s26, %s2046_s27  }
   0x4   :  { %2042 = dma.done.wait [#allocation3], 2048  }
   0x5   :  { %2043 = vsyncadd [#allocation3], 4294965248  ;;  %v48_v0 = vld [vmem:[%s2725_s2 + $0x18] sm:$0xff]  ;;  %v47_v1 = vld [vmem:[%s2725_s2 + $0x10] sm:$0xff]  ;;  %vm66_vm0 = vcmask 261120   ;;  %s2047_s17 = smov 96  }
   0x6   :  { %91 = vmatpush.msra.mxu0 %v48_v0  ;;  %v46_v2 = vld [vmem:[%s2725_s2 + $0x8] sm:$0xff]  ;;  %v45_v3 = vld [vmem:[%s2725_s2] sm:$0xff]  ;;  %v126_v5 = vld [vmem:[%s2726_s3 + $0x18] sm:$0xff]  ;;  %s2048_s14 = smov 112   ;;  %s2049_s15 = smov 80   ;;  %vm198_vm1 = vcmask 130048  }
   0x7   :  { %v1912_v4 = vld [vmem:[%s2728_s5] ss:$0 sm:$0xff]  ;;  %146 = vmatpush.msra.mxu1 %v126_v5  ;;  %v63_v7 = vld [vmem:[%s2723_s0 + $0x8] sm:$0xff]  ;;  %v64_v8 = vld [vmem:[%s2723_s0 + $0x10] sm:$0xff]  ;;  %s2050_s19 = smov 48   ;;  %s2051_s28 = smov 64  }
   0x8   :  { %92 = vmatpush.msra.mxu0 %v47_v1  ;;  %v62_v6 = vld [vmem:[%s2723_s0] sm:$0xff]  ;;  %114 = vrot.lane.b32.xlu0 %v1912_v4, %s2047_s17  ;;  %v65_v9 = vld [vmem:[%s2723_s0 + $0x18] sm:$0xff]  ;;  %v125_v10 = vld [vmem:[%s2726_s3 + $0x10] sm:$0xff]  ;;  %s2052_s29 = smov 16   ;;  %s2053_s30 = smov 32  }
   0x9   :  { %147 = vmatpush.msra.mxu1 %v125_v10  ;;  %v124_v11 = vld [vmem:[%s2726_s3 + $0x8] sm:$0xff]  ;;  %v123_v12 = vld [vmem:[%s2726_s3] sm:$0xff]  ;;  %v1767_v13 = vld [vmem:[%s2726_s3 + $0x38] sm:$0xff] }
   0xa   :  { %93 = vmatpush.msra.mxu0 %v46_v2  ;;  %v1766_v14 = vld [vmem:[%s2726_s3 + $0x30] sm:$0xff]  ;;  %181 = vmatpush.msra.mxu2 %v1767_v13  ;;  %v1765_v15 = vld [vmem:[%s2726_s3 + $0x28] sm:$0xff]  ;;  %v1764_v16 = vld [vmem:[%s2726_s3 + $0x20] sm:$0xff] }
   0xb   :  { %148 = vmatpush.msra.mxu1 %v124_v11  ;;  %v2176_v31 = vld [vmem:[%s2728_s5 + $0x1] ss:$0 sm:$0xff]  ;;  %v2188_v34 = vld [vmem:[%s2728_s5 + $0x2] ss:$0 sm:$0xff]  ;;  %v2243_v61 = vld [vmem:[%s2724_s1 + $0x10] sm:$0xff] }
   0xc   :  { %94 = vmatpush.msra.mxu0 %v45_v3  ;;  %182 = vmatpush.msra.mxu2 %v1766_v14  ;;  %v2234_v56 = vld [vmem:[%s2724_s1] sm:$0xff]  ;;  %vm448_vm3 = vcmp.gt.f32.partialorder %v2243_v61, 0.0  ;;  %v2249_v0 = vld [vmem:[%s2724_s1 + $0x8] sm:$0xff]  ;;  %v2270_v11 = vld [vmem:[%s2724_s1 + $0x18] sm:$0xff] }
   0xd   :  { %1758 = vmatmul.msk.f32.vlgmr.msra.gmra.mxu0 %vm66_vm0, %v62_v6  ;;  %149 = vmatpush.msra.mxu1 %v123_v12  ;;  %vm232_vm2 = vcmp.gt.f32.partialorder %v2234_v56, 0.0  ;;  %vm233_vm4 = vcmp.gt.f32.partialorder %v2249_v0, 0.0  ;;  %vm449_vm5 = vcmp.gt.f32.partialorder %v2270_v11, 0.0 }
   0xe   :  { %183 = vmatpush.msra.mxu2 %v1765_v15 }
  0x10   :  { %184 = vmatpush.msra.mxu2 %v1764_v16 }
  0x15   :  { %1759 = vmatmul.msk.f32.gmra.mxu0 %vm66_vm0, %v63_v7 }
  0x1d   :  { %1760 = vmatmul.msk.f32.gmra.mxu0 %vm66_vm0, %v64_v8 }
  0x25   :  { %1761 = vmatmul.msk.f32.gmra.mxu0 %vm66_vm0, %v65_v9 }
  0x7a   :  { %v115_v23 = vpop.permute.xlu0 %114 }
  0x8a   :  { %v96_v17 = vpop.f32.mrf.mxu0 }
  0x8b   :  { %v2149_v18 = vadd.f32 %v1912_v4, %v96_v17 }
  0x8d   :  { %v111_v19 = vmax.f32 %v2149_v18, 0.0 }
  0x8f   :  { %1762 = vmatmul.msk.f32.vlgmr.msra.gmra.mxu1 %vm66_vm0, %v111_v19 }
  0x92   :  { %v99_v20 = vpop.f32.mrf.mxu0 }
  0x93   :  { %v2155_v21 = vadd.f32 %v1912_v4, %v99_v20 }
  0x95   :  { %v112_v22 = vmax.f32 %v2155_v21, 0.0 }
  0x97   :  { %1763 = vmatmul.msk.f32.gmra.mxu1 %vm66_vm0, %v112_v22  ;;  %v865_v18 = vmul.f32 0.26894143, %v112_v22  ;;  %v2470_v22 = vld [vmem:[%s2728_s5 + $0x3] ss:$0 sm:$0xff] }
  0x9a   :  { %v102_v24 = vpop.f32.mrf.mxu0 }
  0x9b   :  { %v2161_v25 = vadd.f32 %v115_v23, %v102_v24 }
  0x9d   :  { %v119_v26 = vmax.f32 %v2161_v25, 0.0 }
  0x9f   :  { %1768 = vmatmul.msk.f32.vlgmr.msra.gmra.mxu2 %vm66_vm0, %v119_v26 }
  0xa2   :  { %v105_v27 = vpop.f32.mrf.mxu0 }
  0xa3   :  { %v2167_v28 = vadd.f32 %v115_v23, %v105_v27 }
  0xa5   :  { %v120_v29 = vmax.f32 %v2167_v28, 0.0  ;;  %v2461_v28 = vld [vmem:[%s2728_s5 + $0x4] ss:$0 sm:$0xff] }
  0xa7   :  { %1769 = vmatmul.msk.f32.gmra.mxu2 %vm66_vm0, %v120_v29 }
 0x10c   :  { %v151_v30 = vpop.f32.mrf.mxu1 }
 0x10d   :  { %v2193_v38 = vadd.f32 %v2176_v31, %v151_v30 }
 0x114   :  { %v154_v32 = vpop.f32.mrf.mxu1 }
 0x115   :  { %v2179_v33 = vadd.f32 %v2176_v31, %v154_v32 }
 0x117   :  { %301 = vrot.lane.b32.xlu2 %v2179_v33, %s2048_s14  ;;  %v1875_v7 = vpack.i.bf16 %v2193_v38, %v2179_v33 }
 0x11f   :  { %521 = vrot.lane.b32.xlu2 %v2179_v33, %s2049_s15 }
 0x122   :  { %v186_v35 = vpop.f32.mrf.mxu2 }
 0x123   :  { %v187_v36 = vadd.f32 %v2188_v34, %v186_v35 }
 0x125   :  { %303 = vrot.lane.b32.xlu1 %v187_v36, %s2049_s15 }
 0x12a   :  { %v189_v37 = vpop.f32.mrf.mxu2 }
 0x12b   :  { %v190_v39 = vadd.f32 %v2188_v34, %v189_v37 }
 0x12d   :  { %299 = vrot.lane.b32.xlu1 %v2193_v38, %s2048_s14  ;;  %517 = vrot.lane.b32.xlu2 %v190_v39, %s2048_s14  ;;  %v2209_v40 = vpack.i.bf16 %v187_v36, %v190_v39 }
 0x12e   :  { %305 = vrot.lane.b32.xlu0 %v190_v39, %s2049_s15 }
 0x135   :  { %515 = vrot.lane.b32.xlu1 %v187_v36, %s2048_s14  ;;  %415 = vrot.lane.b32.xlu2 %v2179_v33, %s2047_s17 }
 0x136   :  { %519 = vrot.lane.b32.xlu0 %v2193_v38, %s2049_s15 }
 0x13d   :  { %194 = vrot.lane.b32.xlu1 %v187_v36, %s2047_s17 }
 0x13e   :  { %196 = vrot.lane.b32.xlu0 %v190_v39, %s2047_s17 }
 0x146   :  { %413 = vrot.lane.b32.xlu0 %v2193_v38, %s2047_s17 }
 0x14e   :  { %1871 = vrot.lane.b32.xlu0 %v2209_v40, %s2050_s19 }
 0x171   :  { %v302_v41 = vpop.permute.xlu2 %301 }
 0x179   :  { %v522_v42 = vpop.permute.xlu2 %521 }
 0x187   :  { %v518_v43 = vpop.permute.xlu2 %517 }
 0x18f   :  { %v416_v44 = vpop.permute.xlu2 %415 }
 0x190   :  { %1782 = vmatpush.xpose.msk.msrb.mxu0 %vm198_vm1, %v416_v44 }
 0x197   :  { %v304_v45 = vpop.permute.xlu1 %303 }
 0x19f   :  { %v300_v46 = vpop.permute.xlu1 %299 }
 0x1a0   :  { %v306_v47 = vpop.permute.xlu0 %305 }
 0x1a1   :  { %1776 = vmatpush.xpose.msk.msrb.mxu2 %vm198_vm1, %v306_v47 }
 0x1a5   :  { %1777 = vmatpush.xpose.msk.msrb.mxu2 %vm198_vm1, %v304_v45 }
 0x1a7   :  { %v516_v49 = vpop.permute.xlu1 %515 }
 0x1a8   :  { %1778 = vmatmul.msk.f32.vlgmr.msrb.gmra.mxu2 %vm198_vm1, %v300_v46  ;;  %v520_v48 = vpop.permute.xlu0 %519 }
 0x1a9   :  { %1788 = vmatpush.xpose.msk.msra.mxu2 %vm198_vm1, %v522_v42 }
 0x1ad   :  { %1789 = vmatpush.xpose.msk.msra.mxu2 %vm198_vm1, %v520_v48 }
 0x1af   :  { %v195_v51 = vpop.permute.xlu1 %194 }
 0x1b0   :  { %1779 = vmatmul.msk.f32.gmra.mxu2 %vm198_vm1, %v302_v41  ;;  %v197_v50 = vpop.permute.xlu0 %196 }
 0x1b1   :  { %1770 = vmatpush.xpose.msk.msra.mxu3 %vm198_vm1, %v197_v50 }
 0x1b5   :  { %1771 = vmatpush.xpose.msk.msra.mxu3 %vm198_vm1, %v195_v51 }
 0x1b8   :  { %1772 = vmatmul.msk.f32.vlgmr.msra.gmra.mxu3 %vm198_vm1, %v2193_v38  ;;  %1790 = vmatmul.msk.f32.vlgmr.msra.gmra.mxu2 %vm198_vm1, %v516_v49  ;;  %v414_v52 = vpop.permute.xlu0 %413 }
 0x1b9   :  { %1783 = vmatpush.xpose.msk.msrb.mxu0 %vm198_vm1, %v414_v52 }
 0x1bc   :  { %1784 = vmatmul.msk.f32.vlgmr.msrb.gmra.mxu0 %vm198_vm1, %v187_v36 }
 0x1c0   :  { %1773 = vmatmul.msk.f32.gmra.mxu3 %vm198_vm1, %v2179_v33  ;;  %1791 = vmatmul.msk.f32.gmra.mxu2 %vm198_vm1, %v518_v43  ;;  %v1872_v53 = vpop.permute.xlu0 %1871 }
 0x1c1   :  { %v1873_v54 = vunpack.i.l.bf16 %v1872_v53  ;;  %v1874_v55 = vunpack.i.h.bf16 %v1872_v53 }
 0x1c3   :  { %392 = vmatpush.msrb.mxu3 %v1873_v54 }
 0x1c4   :  { %1785 = vmatmul.msk.f32.gmra.mxu0 %vm198_vm1, %v190_v39 }
 0x1c5   :  { %393 = vmatpush.msrb.mxu3 %v1874_v55 }
 0x22b   :  { %v332_v57 = vpop.f32.mrf.mxu2 }
 0x22c   :  { %v338_v58 = vsel %vm232_vm2, %v332_v57, -1e+30 }
 0x22d   :  { %v340_v59 = vsel %vm198_vm1, %v338_v58, -inf }
 0x22e   :  { %341 = vmax.xlane.f32.xlu1 %v340_v59 }
 0x233   :  { %v335_v60 = vpop.f32.mrf.mxu2 }
 0x234   :  { %v339_v5 = vsel %vm233_vm4, %v335_v60, -1e+30 }
 0x235   :  { %v343_v6 = vsel %vm198_vm1, %v339_v5, -inf }
 0x239   :  { %v442_v15 = vpop.f32.mrf.mxu0 }
 0x23a   :  { %v2283_v16 = vsel %vm448_vm3, %v442_v15, -1e+30 }
 0x23b   :  { %v226_v62 = vpop.f32.mrf.mxu3  ;;  %v548_v63 = vpop.f32.mrf.mxu2  ;;  %v452_v17 = vsel %vm198_vm1, %v2283_v16, -inf }
 0x23c   :  { %v234_v1 = vsel %vm232_vm2, %v226_v62, -1e+30  ;;  %v554_v2 = vsel %vm448_vm3, %v548_v63, -1e+30 }
 0x23d   :  { %v556_v3 = vsel %vm198_vm1, %v554_v2, -inf  ;;  %v236_v4 = vsel %vm198_vm1, %v234_v1, -inf }
 0x23e   :  { %557 = vmax.xlane.f32.xlu0 %v556_v3  ;;  %237 = vmax.xlane.f32.xlu2 %v236_v4 }
 0x241   :  { %v445_v20 = vpop.f32.mrf.mxu0 }
 0x242   :  { %v2289_v23 = vsel %vm449_vm5, %v445_v20, -1e+30 }
 0x243   :  { %v229_v8 = vpop.f32.mrf.mxu3  ;;  %v551_v12 = vpop.f32.mrf.mxu2  ;;  %v455_v24 = vsel %vm198_vm1, %v2289_v23, -inf }
 0x244   :  { %v235_v9 = vsel %vm233_vm4, %v229_v8, -1e+30  ;;  %v2275_v13 = vsel %vm449_vm5, %v551_v12, -1e+30 }
 0x245   :  { %v239_v10 = vsel %vm198_vm1, %v235_v9, -inf  ;;  %v559_v14 = vsel %vm198_vm1, %v2275_v13, -inf }
 0x246   :  { %344 = vmax.xlane.f32.xlu2 %v343_v6 }
 0x247   :  { %1876 = vrot.lane.b32.xlu1 %v1875_v7, %s2050_s19 }
 0x24e   :  { %240 = vmax.xlane.f32.xlu2 %v239_v10 }
 0x252   :  { %1881 = vrot.lane.b32.xlu0 %v2209_v40, %s2051_s28 }
 0x256   :  { %560 = vmax.xlane.f32.xlu2 %v559_v14 }
 0x25e   :  { %453 = vmax.xlane.f32.xlu2 %v452_v17 }
 0x271   :  { %456 = vmax.xlane.f32.xlu1 %v455_v24 }
 0x276   :  { %1886 = vrot.lane.b32.xlu2 %v1875_v7, %s2051_s28 }
 0x2a1   :  { %v342_v27 = vpop.xlane.xlu1 %341 }
 0x2a2   :  { %v346_v30 = vsub.f32 %v338_v58, %v342_v27 }
 0x2a4   :  { %v348_v32 = vmul.f32 1.442695, %v346_v30 }
 0x2a6   :  { %1917 = vpow2.f32 %v348_v32 }
 0x2ac   :  { %v1918_v33 = vpop.eup %1917 }
 0x2ad   :  { %v352_v35 = vmul.f32 %v1918_v33, %v2234_v56 }
 0x2af   :  { %1780 = vmatmul.msk.f32.vlgmr.msrb.gmra.mxu3 %vm198_vm1, %v352_v35  ;;  %v354_v36 = vsel %vm198_vm1, %v352_v35, 0.0 }
 0x2b0   :  { %355 = vadd.xlane.f32.xlu1 %v354_v36 }
 0x2b1   :  { %v558_v37 = vpop.xlane.xlu0 %557  ;;  %v238_v38 = vpop.xlane.xlu2 %237 }
 0x2b2   :  { %v562_v39 = vsub.f32 %v554_v2, %v558_v37  ;;  %v242_v41 = vsub.f32 %v234_v1, %v238_v38 }
 0x2b4   :  { %v564_v40 = vmul.f32 1.442695, %v562_v39  ;;  %v244_v46 = vmul.f32 1.442695, %v242_v41 }
 0x2b6   :  { %1919 = vpow2.f32 %v564_v40 }
 0x2b9   :  { %v1877_v42 = vpop.permute.xlu1 %1876  ;;  %v345_v43 = vpop.xlane.xlu2 %344 }
 0x2ba   :  { %v1878_v44 = vunpack.i.l.bf16 %v1877_v42  ;;  %v347_v45 = vsub.f32 %v339_v5, %v345_v43  ;;  %v1879_v48 = vunpack.i.h.bf16 %v1877_v42 }
 0x2bc   :  { %v1920_v47 = vpop.eup %1919  ;;  %v350_v49 = vmul.f32 1.442695, %v347_v45  ;;  %608 = vmatpush.msra.mxu3 %v1878_v44 }
 0x2bd   :  { %v568_v50 = vmul.f32 %v1920_v47, %v2243_v61 }
 0x2be   :  { %1921 = vpow2.f32 %v350_v49  ;;  %609 = vmatpush.msra.mxu3 %v1879_v48 }
 0x2bf   :  { %1923 = vpow2.f32 %v244_v46  ;;  %v570_v51 = vsel %vm198_vm1, %v568_v50, 0.0 }
 0x2c0   :  { %571 = vadd.xlane.f32.xlu0 %v570_v51 }
 0x2c1   :  { %v241_v52 = vpop.xlane.xlu2 %240 }
 0x2c2   :  { %v243_v53 = vsub.f32 %v235_v9, %v241_v52 }
 0x2c4   :  { %v1922_v54 = vpop.eup %1921  ;;  %v246_v55 = vmul.f32 1.442695, %v243_v53  ;;  %v1882_v57 = vpop.permute.xlu0 %1881 }
 0x2c5   :  { %v1924_v58 = vpop.eup %1923  ;;  %v1883_v59 = vunpack.i.l.bf16 %v1882_v57  ;;  %v353_v60 = vmul.f32 %v1922_v54, %v2249_v0  ;;  %v1884_v63 = vunpack.i.h.bf16 %v1882_v57 }
 0x2c6   :  { %1925 = vpow2.f32 %v246_v55  ;;  %v248_v1 = vmul.f32 %v1924_v58, %v2234_v56 }
 0x2c7   :  { %288 = vmatpush.msrb.mxu1 %v1883_v59  ;;  %1781 = vmatmul.msk.f32.gmra.mxu3 %vm198_vm1, %v353_v60  ;;  %v357_v62 = vsel %vm198_vm1, %v353_v60, 0.0 }
 0x2c8   :  { %358 = vadd.xlane.f32.xlu1 %v357_v62  ;;  %v250_v37 = vsel %vm198_vm1, %v248_v1, 0.0 }
 0x2c9   :  { %289 = vmatpush.msrb.mxu1 %v1884_v63  ;;  %v561_v2 = vpop.xlane.xlu2 %560 }
 0x2ca   :  { %v563_v3 = vsub.f32 %v2275_v13, %v561_v2  ;;  %1774 = vmatmul.msk.f32.vlgmr.msrb.gmra.mxu1 %vm198_vm1, %v248_v1 }
 0x2cc   :  { %v566_v4 = vmul.f32 1.442695, %v563_v3  ;;  %v1926_v5 = vpop.eup %1925 }
 0x2cd   :  { %v249_v6 = vmul.f32 %v1926_v5, %v2249_v0 }
 0x2ce   :  { %1927 = vpow2.f32 %v566_v4 }
 0x2cf   :  { %1792 = vmatmul.msk.f32.vlgmr.msra.gmra.mxu3 %vm198_vm1, %v568_v50  ;;  %v253_v38 = vsel %vm198_vm1, %v249_v6, 0.0 }
 0x2d1   :  { %v454_v7 = vpop.xlane.xlu2 %453 }
 0x2d2   :  { %v458_v8 = vsub.f32 %v2283_v16, %v454_v7  ;;  %1775 = vmatmul.msk.f32.gmra.mxu1 %vm198_vm1, %v249_v6 }
 0x2d4   :  { %v1928_v9 = vpop.eup %1927  ;;  %v460_v10 = vmul.f32 1.442695, %v458_v8 }
 0x2d5   :  { %v569_v12 = vmul.f32 %v1928_v9, %v2270_v11 }
 0x2d6   :  { %1929 = vpow2.f32 %v460_v10 }
 0x2d7   :  { %1793 = vmatmul.msk.f32.gmra.mxu3 %vm198_vm1, %v569_v12  ;;  %v573_v13 = vsel %vm198_vm1, %v569_v12, 0.0 }
 0x2d8   :  { %574 = vadd.xlane.f32.xlu2 %v573_v13 }
 0x2d9   :  { %v1887_v14 = vpop.permute.xlu2 %1886 }
 0x2da   :  { %v1888_v15 = vunpack.i.l.bf16 %v1887_v14  ;;  %v1889_v20 = vunpack.i.h.bf16 %v1887_v14 }
 0x2dc   :  { %v1930_v17 = vpop.eup %1929  ;;  %504 = vmatpush.msra.mxu1 %v1888_v15 }
 0x2dd   :  { %v464_v24 = vmul.f32 %v1930_v17, %v2243_v61 }
 0x2de   :  { %505 = vmatpush.msra.mxu1 %v1889_v20 }
 0x2df   :  { %1786 = vmatmul.msk.f32.vlgmr.msra.gmra.mxu1 %vm198_vm1, %v464_v24  ;;  %v466_v16 = vsel %vm198_vm1, %v464_v24, 0.0 }
 0x2e0   :  { %467 = vadd.xlane.f32.xlu0 %v466_v16 }
 0x2e4   :  { %v457_v27 = vpop.xlane.xlu1 %456 }
 0x2e5   :  { %v459_v30 = vsub.f32 %v2289_v23, %v457_v27 }
 0x2e7   :  { %v462_v32 = vmul.f32 1.442695, %v459_v30 }
 0x2e9   :  { %1931 = vpow2.f32 %v462_v32 }
 0x2ef   :  { %v1932_v33 = vpop.eup %1931 }
 0x2f0   :  { %v465_v35 = vmul.f32 %v1932_v33, %v2270_v11 }
 0x2f2   :  { %1787 = vmatmul.msk.f32.gmra.mxu1 %vm198_vm1, %v465_v35  ;;  %v469_v36 = vsel %vm198_vm1, %v465_v35, 0.0 }
 0x2f3   :  { %470 = vadd.xlane.f32.xlu1 %v469_v36 }
 0x2fb   :  { %251 = vadd.xlane.f32.xlu1 %v250_v37 }
 0x303   :  { %254 = vadd.xlane.f32.xlu1 %v253_v38 }
 0x323   :  { %v356_v39 = vpop.xlane.xlu1 %355 }
 0x324   :  { %vm360_vm8 = vcmp.gt.f32.partialorder %v356_v39, 0.0 }
 0x325   :  { %v362_v48 = vsel %vm360_vm8, %v356_v39, 1.0 }
 0x332   :  { %v395_v41 = vpop.f32.mrf.mxu3 }
 0x333   :  { %v572_v42 = vpop.xlane.xlu0 %571 }
 0x334   :  { %vm576_vm7 = vcmp.gt.f32.partialorder %v572_v42, 0.0 }
 0x335   :  { %v578_v43 = vsel %vm576_vm7, %v572_v42, 1.0 }
 0x33b   :  { %v359_v40 = vpop.xlane.xlu1 %358 }
 0x33c   :  { %vm361_vm6 = vcmp.gt.f32.partialorder %v359_v40, 0.0 }
 0x33d   :  { %v363_v23 = vsel %vm361_vm6, %v359_v40, 1.0 }
 0x33e   :  { %1933 = vrcp.f32 %v363_v23 }
 0x33f   :  { %1935 = vrcp.f32 %v578_v43 }
 0x340   :  { %1937 = vrcp.f32 %v362_v48 }
 0x344   :  { %v1934_v44 = vpop.eup %1933 }
 0x345   :  { %v1936_v50 = vpop.eup %1935 }
 0x346   :  { %v1938_v53 = vpop.eup %1937 }
 0x347   :  { %v401_v57 = vmul.f32 %v1938_v53, %v395_v41  ;;  %v291_v60 = vpop.f32.mrf.mxu1 }
 0x34a   :  { %v398_v45 = vpop.f32.mrf.mxu3 }
 0x34b   :  { %v402_v46 = vmul.f32 %v1934_v44, %v398_v45  ;;  %v575_v47 = vpop.xlane.xlu2 %574 }
 0x34c   :  { %vm577_vm9 = vcmp.gt.f32.partialorder %v575_v47, 0.0 }
 0x34d   :  { %407 = vrot.lane.b32.xlu1 %v402_v46, %s2052_s29  ;;  %v579_v49 = vsel %vm577_vm9, %v575_v47, 1.0 }
 0x34e   :  { %1939 = vrcp.f32 %v579_v49 }
 0x34f   :  { %v294_v63 = vpop.f32.mrf.mxu1 }
 0x352   :  { %v611_v51 = vpop.f32.mrf.mxu3 }
 0x353   :  { %v617_v52 = vmul.f32 %v1936_v50, %v611_v51  ;;  %v468_v7 = vpop.xlane.xlu0 %467 }
 0x354   :  { %v1940_v54 = vpop.eup %1939  ;;  %vm472_vm12 = vcmp.gt.f32.partialorder %v468_v7, 0.0 }
 0x355   :  { %621 = vrot.lane.b32.xlu0 %v617_v52, %s2052_s29  ;;  %v474_v12 = vsel %vm472_vm12, %v468_v7, 1.0 }
 0x35a   :  { %v614_v55 = vpop.f32.mrf.mxu3 }
 0x35b   :  { %v618_v58 = vmul.f32 %v1940_v54, %v614_v55 }
 0x35c   :  { %v507_v2 = vpop.f32.mrf.mxu1 }
 0x35d   :  { %405 = vrot.lane.b32.xlu0 %v401_v57, %s2052_s29  ;;  %623 = vrot.lane.b32.xlu2 %v618_v58, %s2052_s29 }
 0x365   :  { %832 = vrot.lane.b32.xlu0 %v2188_v34, %s2053_s30  ;;  %714 = vrot.lane.b32.xlu2 %v2176_v31, %s2053_s30 }
 0x366   :  { %v471_v59 = vpop.xlane.xlu1 %470 }
 0x367   :  { %vm473_vm10 = vcmp.gt.f32.partialorder %v471_v59, 0.0 }
 0x368   :  { %v475_v1 = vsel %vm473_vm10, %v471_v59, 1.0 }
 0x369   :  { %1941 = vrcp.f32 %v475_v1 }
 0x36e   :  { %v252_v62 = vpop.xlane.xlu1 %251 }
 0x36f   :  { %v1942_v5 = vpop.eup %1941  ;;  %v510_v6 = vpop.f32.mrf.mxu1  ;;  %vm256_vm13 = vcmp.gt.f32.partialorder %v252_v62, 0.0 }
 0x370   :  { %v514_v8 = vmul.f32 %v1942_v5, %v510_v6  ;;  %v258_v16 = vsel %vm256_vm13, %v252_v62, 1.0 }
 0x376   :  { %v255_v3 = vpop.xlane.xlu1 %254 }
 0x377   :  { %vm257_vm11 = vcmp.gt.f32.partialorder %v255_v3, 0.0 }
 0x378   :  { %v259_v4 = vsel %vm257_vm11, %v255_v3, 1.0 }
 0x379   :  { %1943 = vrcp.f32 %v259_v4 }
 0x37a   :  { %1945 = vrcp.f32 %v474_v12 }
 0x37f   :  { %v1944_v10 = vpop.eup %1943 }
 0x380   :  { %v298_v15 = vmul.f32 %v1944_v10, %v294_v63  ;;  %v1946_v30 = vpop.eup %1945 }
 0x381   :  { %v513_v36 = vmul.f32 %v1946_v30, %v507_v2 }
 0x3b7   :  { %v624_v34 = vpop.permute.xlu2 %623 }
 0x3b8   :  { %v2330_v31 = vsel %vm198_vm1, %v514_v8, %v624_v34 }
 0x3b9   :  { %v2333_v9 = vmul.f32 0.70710677, %v2330_v31 }
 0x3bb   :  { %v2336_v13 = vand.u32 2147483647, %v2333_v9 }
 0x3bd   :  { %v753_v14 = vmul.f32 0.3275911, %v2336_v13 }
 0x3bf   :  { %v755_v17 = vadd.f32 1.0, %v753_v14  ;;  %v408_v20 = vpop.permute.xlu1 %407 }
 0x3c0   :  { %v2340_v24 = vsel %vm198_vm1, %v298_v15, %v408_v20  ;;  %v830_v15 = vld [vmem:[#allocation2 + $0x38] sm:$0xff] }
 0x3c1   :  { %1947 = vrcp.f32 %v755_v17  ;;  %v2343_v27 = vmul.f32 0.70710677, %v2340_v24  ;;  %v782_v44 = vand.u32 2147483648, %v755_v17  ;;  %v780_v45 = vand.u32 2147483647, %v755_v17  ;;  %853 = vmatpush.msrb.mxu1 %v830_v15 }
 0x3c2   :  { %1949 = vrcp.f32 %v258_v16  ;;  %vm776_vm15 = vweird.f32 %v755_v17  ;;  %v829_v16 = vld [vmem:[#allocation2 + $0x30] sm:$0xff] }
 0x3c3   :  { %v2346_v32 = vand.u32 2147483647, %v2343_v27  ;;  %v783_v52 = vor.u32 1.1754944e-38, %v782_v44  ;;  %vm781_vm7 = vcmp.eq.f32.partialorder %v780_v45, 8.507059e+37  ;;  %854 = vmatpush.msrb.mxu1 %v829_v16 }
 0x3c5   :  { %v636_v33 = vmul.f32 0.3275911, %v2346_v32 }
 0x3c7   :  { %v1948_v35 = vpop.eup %1947  ;;  %v622_v37 = vpop.permute.xlu0 %621  ;;  %v638_v39 = vadd.f32 1.0, %v636_v33 }
 0x3c8   :  { %v772_v38 = vmul.f32 %v1948_v35, %v755_v17  ;;  %v2350_v40 = vsel %vm198_vm1, %v513_v36, %v622_v37  ;;  %v1950_v41 = vpop.eup %1949  ;;  %vm777_vm14 = vweird.f32 %v1948_v35 }
 0x3c9   :  { %1951 = vrcp.f32 %v638_v39  ;;  %v2353_v42 = vmul.f32 0.70710677, %v2350_v40  ;;  %v297_v48 = vmul.f32 %v1950_v41, %v291_v60  ;;  %vm778_vm6 = vmor %vm776_vm15, %vm777_vm14  ;;  %v665_v1 = vand.u32 2147483648, %v638_v39 }
 0x3ca   :  { %v773_v23 = vsub.f32 1.0, %v772_v38  ;;  %v663_v3 = vand.u32 2147483647, %v638_v39  ;;  %vm659_vm9 = vweird.f32 %v638_v39  ;;  %v828_v38 = vld [vmem:[#allocation2 + $0x28] sm:$0xff] }
 0x3cb   :  { %v2356_v46 = vand.u32 2147483647, %v2353_v42  ;;  %v666_v34 = vor.u32 1.1754944e-38, %v665_v1  ;;  %855 = vmatpush.msrb.mxu1 %v828_v38  ;;  %v711_v1 = vld [vmem:[#allocation2 + $0x10] sm:$0xff] }
 0x3cc   :  { %v774_v43 = vmul.f32 %v1948_v35, %v773_v23  ;;  %vm664_vm11 = vcmp.eq.f32.partialorder %v663_v3, 8.507059e+37 }
 0x3cd   :  { %v752_v49 = vmul.f32 0.3275911, %v2356_v46 }
 0x3ce   :  { %v775_v47 = vadd.f32 %v1948_v35, %v774_v43  ;;  %v827_v43 = vld [vmem:[#allocation2 + $0x20] sm:$0xff] }
 0x3cf   :  { %v406_v50 = vpop.permute.xlu0 %405  ;;  %v1952_v51 = vpop.eup %1951  ;;  %v754_v57 = vadd.f32 1.0, %v752_v49  ;;  %856 = vmatpush.msrb.mxu1 %v827_v43 }
 0x3d0   :  { %v2360_v53 = vsel %vm198_vm1, %v297_v48, %v406_v50  ;;  %v779_v54 = vsel %vm778_vm6, %v1948_v35, %v775_v47  ;;  %v655_v55 = vmul.f32 %v1952_v51, %v638_v39  ;;  %vm660_vm8 = vweird.f32 %v1952_v51 }
 0x3d1   :  { %v2363_v58 = vmul.f32 0.70710677, %v2360_v53  ;;  %v2365_v59 = vsel %vm781_vm7, %v783_v52, %v779_v54  ;;  %1953 = vrcp.f32 %v754_v57  ;;  %vm661_vm10 = vmor %vm659_vm9, %vm660_vm8  ;;  %v767_v35 = vand.u32 2147483648, %v754_v57 }
 0x3d2   :  { %v656_v62 = vsub.f32 1.0, %v655_v55  ;;  %v787_v2 = vmul.f32 1.0614054, %v2365_v59  ;;  %v765_v37 = vand.u32 2147483647, %v754_v57  ;;  %vm761_vm13 = vweird.f32 %v754_v57 }
 0x3d3   :  { %v2368_v60 = vand.u32 2147483647, %v2363_v58  ;;  %v805_v47 = vmul.f32 %v2336_v13, %v2336_v13  ;;  %v768_v48 = vor.u32 1.1754944e-38, %v767_v35  ;;  %v804_v54 = vmul.f32 %v2356_v46, %v2356_v46 }
 0x3d4   :  { %v657_v63 = vmul.f32 %v1952_v51, %v656_v62  ;;  %v1801_v6 = vadd.f32 -1.4531521, %v787_v2  ;;  %vm766_vm15 = vcmp.eq.f32.partialorder %v765_v37, 8.507059e+37 }
 0x3d5   :  { %v635_v4 = vmul.f32 0.3275911, %v2368_v60  ;;  %v807_v2 = vsub.f32 0.0, %v805_v47 }
 0x3d6   :  { %v658_v5 = vadd.f32 %v1952_v51, %v657_v63  ;;  %v791_v10 = vmul.f32 %v1801_v6, %v2365_v59  ;;  %v710_v6 = vld [vmem:[#allocation2 + $0x8] sm:$0xff] }
 0x3d7   :  { %v2372_v7 = vadd.f32 1.0, %v635_v4  ;;  %v1954_v8 = vpop.eup %1953  ;;  %v810_v16 = vmul.f32 1.442695, %v807_v2 }
 0x3d8   :  { %v662_v12 = vsel %vm661_vm10, %v1952_v51, %v658_v5  ;;  %v757_v14 = vmul.f32 %v1954_v8, %v754_v57  ;;  %v793_v30 = vadd.f32 1.4214138, %v791_v10  ;;  %vm762_vm12 = vweird.f32 %v1954_v8  ;;  %v712_v51 = vld [vmem:[#allocation2 + $0x18] sm:$0xff] }
 0x3d9   :  { %1955 = vrcp.f32 %v2372_v7  ;;  %v2376_v17 = vsel %vm664_vm11, %v666_v34, %v662_v12  ;;  %vm763_vm14 = vmor %vm761_vm13, %vm762_vm12  ;;  %735 = vmatpush.msra.mxu0 %v712_v51  ;;  %v650_v63 = vand.u32 2147483648, %v2372_v7  ;;  %v648_v4 = vand.u32 2147483647, %v2372_v7  ;;  %v1814_v51 = vld [vmem:[%s2726_s3 + $0x70] sm:$0xff] }
 0x3da   :  { %v758_v20 = vsub.f32 1.0, %v757_v14  ;;  %v670_v33 = vmul.f32 1.0614054, %v2376_v17  ;;  %v795_v44 = vmul.f32 %v793_v30, %v2365_v59  ;;  %v806_v34 = vsub.f32 0.0, %v804_v54 }
 0x3db   :  { %736 = vmatpush.msra.mxu0 %v711_v1  ;;  %vm644_vm7 = vweird.f32 %v2372_v7  ;;  %v688_v12 = vmul.f32 %v2346_v32, %v2346_v32  ;;  %v651_v15 = vor.u32 1.1754944e-38, %v650_v63  ;;  %vm649_vm9 = vcmp.eq.f32.partialorder %v648_v4, 8.507059e+37 }
 0x3dc   :  { %v759_v36 = vmul.f32 %v1954_v8, %v758_v20  ;;  %v1795_v39 = vadd.f32 -1.4531521, %v670_v33  ;;  %v1803_v13 = vadd.f32 -0.28449672, %v795_v44  ;;  %1957 = vpow2.f32 %v810_v16 }
 0x3dd   :  { %737 = vmatpush.msra.mxu0 %v710_v6  ;;  %vm816_vm10 = vcmp.lt.f32.partialorder %v2353_v42, 0.0  ;;  %vm817_vm11 = vcmp.lt.f32.partialorder %v2333_v9, 0.0  ;;  %vm699_vm12 = vcmp.lt.f32.partialorder %v2363_v58, 0.0  ;;  %vm700_vm13 = vcmp.lt.f32.partialorder %v2343_v27, 0.0  ;;  %v1809_v27 = vld [vmem:[%s2726_s3 + $0x58] sm:$0xff] }
 0x3de   :  { %v760_v41 = vadd.f32 %v1954_v8, %v759_v36  ;;  %v674_v45 = vmul.f32 %v1795_v39, %v2376_v17  ;;  %v799_v20 = vmul.f32 %v1803_v13, %v2365_v59  ;;  %v808_v36 = vmul.f32 1.442695, %v806_v34  ;;  %898 = vmatpush.msrb.mxu2 %v1809_v27 }
 0x3df   :  { %v1956_v23 = vpop.eup %1955  ;;  %v690_v39 = vsub.f32 0.0, %v688_v12  ;;  %v630_v58 = vmul.f32 0.5, %v2340_v24  ;;  %v1808_v24 = vld [vmem:[%s2726_s3 + $0x50] sm:$0xff] }
 0x3e0   :  { %v640_v49 = vmul.f32 %v1956_v23, %v2372_v7  ;;  %v764_v50 = vsel %vm763_vm14, %v1954_v8, %v760_v41  ;;  %v676_v57 = vadd.f32 1.4214138, %v674_v45  ;;  %vm645_vm6 = vweird.f32 %v1956_v23  ;;  %v709_v8 = vld [vmem:[#allocation2] sm:$0xff]  ;;  %899 = vmatpush.msrb.mxu2 %v1808_v24 }
 0x3e1   :  { %v769_v52 = vsel %vm766_vm15, %v768_v48, %v764_v50  ;;  %vm646_vm8 = vmor %vm644_vm7, %vm645_vm6  ;;  %738 = vmatpush.msra.mxu0 %v709_v8  ;;  %v687_v7 = vmul.f32 %v2368_v60, %v2368_v60  ;;  %v801_v32 = vadd.f32 0.2548296, %v799_v20  ;;  %1959 = vpow2.f32 %v808_v36  ;;  %v1815_v60 = vld [vmem:[%s2726_s3 + $0x78] sm:$0xff] }
 0x3e2   :  { %v641_v55 = vsub.f32 1.0, %v640_v49  ;;  %v786_v62 = vmul.f32 1.0614054, %v769_v52  ;;  %v678_v46 = vmul.f32 %v676_v57, %v2376_v17  ;;  %v693_v48 = vmul.f32 1.442695, %v690_v39  ;;  %933 = vmatpush.msrb.mxu3 %v1815_v60 }
 0x3e3   :  { %v689_v45 = vsub.f32 0.0, %v687_v7  ;;  %v803_v50 = vmul.f32 %v801_v32, %v2365_v59  ;;  %v629_v32 = vmul.f32 0.5, %v2360_v53  ;;  %v1813_v53 = vld [vmem:[%s2726_s3 + $0x68] sm:$0xff] }
 0x3e4   :  { %v642_v3 = vmul.f32 %v1956_v23, %v641_v55  ;;  %v1800_v5 = vadd.f32 -1.4531521, %v786_v62  ;;  %v1797_v38 = vadd.f32 -0.28449672, %v678_v46  ;;  %v1958_v62 = vpop.eup %1957  ;;  %934 = vmatpush.msrb.mxu3 %v1814_v51  ;;  %1961 = vpow2.f32 %v693_v48  ;;  %v1807_v48 = vld [vmem:[%s2726_s3 + $0x48] sm:$0xff] }
 0x3e5   :  { %v691_v57 = vmul.f32 1.442695, %v689_v45  ;;  %v813_v2 = vmul.f32 %v1958_v62, %v803_v50  ;;  %900 = vmatpush.msrb.mxu2 %v1807_v48  ;;  %v833_v50 = vpop.permute.xlu0 %832  ;;  %v868_v51 = vmul.f32 0.26894143, %v119_v26 }
 0x3e6   :  { %v643_v10 = vadd.f32 %v1956_v23, %v642_v3  ;;  %v790_v14 = vmul.f32 %v1800_v5, %v769_v52  ;;  %935 = vmatpush.msrb.mxu3 %v1813_v53 }
 0x3e7   :  { %v1960_v59 = vpop.eup %1959  ;;  %1963 = vpow2.f32 %v691_v57  ;;  %v815_v34 = vsub.f32 1.0, %v813_v2  ;;  %v715_v57 = vpop.permute.xlu2 %714  ;;  %v869_v2 = vmul.f32 0.26894143, %v120_v29 }
 0x3e8   :  { %v647_v30 = vsel %vm646_vm8, %v1956_v23, %v643_v10  ;;  %v792_v33 = vadd.f32 1.4214138, %v790_v14  ;;  %v682_v23 = vmul.f32 %v1797_v38, %v2376_v17 }
 0x3e9   :  { %v652_v35 = vsel %vm649_vm9, %v651_v15, %v647_v30  ;;  %v746_v30 = vmul.f32 0.5, %v2350_v40  ;;  %v747_v40 = vmul.f32 0.5, %v2330_v31  ;;  %v1812_v31 = vld [vmem:[%s2726_s3 + $0x60] sm:$0xff] }
 0x3ea   :  { %v669_v37 = vmul.f32 1.0614054, %v652_v35  ;;  %v794_v41 = vmul.f32 %v792_v33, %v769_v52  ;;  %v684_v1 = vadd.f32 0.2548296, %v682_v23  ;;  %v1962_v46 = vpop.eup %1961  ;;  %936 = vmatpush.msrb.mxu3 %v1812_v31 }
 0x3ec   :  { %v1794_v43 = vadd.f32 -1.4531521, %v669_v37  ;;  %v1802_v44 = vadd.f32 -0.28449672, %v794_v41  ;;  %v686_v6 = vmul.f32 %v684_v1, %v2376_v17 }
 0x3ed   :  { %v1964_v20 = vpop.eup %1963 }
 0x3ee   :  { %v673_v47 = vmul.f32 %v1794_v43, %v652_v35  ;;  %v798_v49 = vmul.f32 %v1802_v44, %v769_v52  ;;  %v696_v15 = vmul.f32 %v1962_v46, %v686_v6 }
 0x3f0   :  { %v675_v54 = vadd.f32 1.4214138, %v673_v47  ;;  %v800_v55 = vadd.f32 0.2548296, %v798_v49  ;;  %v698_v37 = vsub.f32 1.0, %v696_v15  ;;  %v1806_v49 = vld [vmem:[%s2726_s3 + $0x40] sm:$0xff] }
 0x3f1   :  { %901 = vmatpush.msrb.mxu2 %v1806_v49 }
 0x3f2   :  { %v677_v63 = vmul.f32 %v675_v54, %v652_v35  ;;  %v802_v13 = vmul.f32 %v800_v55, %v769_v52  ;;  %v819_v52 = vsub.f32 0.0, %v815_v34  ;;  %v702_v41 = vsub.f32 0.0, %v698_v37 }
 0x3f4   :  { %v1796_v3 = vadd.f32 -0.28449672, %v677_v63  ;;  %v812_v4 = vmul.f32 %v1960_v59, %v802_v13  ;;  %v821_v38 = vsel %vm817_vm11, %v819_v52, %v815_v34  ;;  %v704_v45 = vsel %vm700_vm13, %v702_v41, %v698_v37 }
 0x3f5   :  { %v706_v47 = vadd.f32 1.0, %v704_v45  ;;  %v864_v63 = vmul.f32 0.26894143, %v111_v19 }
 0x3f6   :  { %v681_v5 = vmul.f32 %v1796_v3, %v652_v35  ;;  %v814_v8 = vsub.f32 1.0, %v812_v4 }
 0x3f7   :  { %v708_v23 = vmul.f32 %v706_v47, %v630_v58 }
 0x3f8   :  { %v683_v10 = vadd.f32 0.2548296, %v681_v5  ;;  %v818_v12 = vsub.f32 0.0, %v814_v8 }
 0x3fa   :  { %v685_v14 = vmul.f32 %v683_v10, %v652_v35  ;;  %v820_v16 = vsel %vm816_vm10, %v818_v12, %v814_v8  ;;  %v823_v35 = vadd.f32 1.0, %v821_v38 }
 0x3fb   :  { %v822_v33 = vadd.f32 1.0, %v820_v16 }
 0x3fc   :  { %v695_v7 = vmul.f32 %v1964_v20, %v685_v14  ;;  %v825_v44 = vmul.f32 %v823_v35, %v747_v40 }
 0x3fd   :  { %v824_v36 = vmul.f32 %v822_v33, %v746_v30 }
 0x3fe   :  { %v697_v17 = vsub.f32 1.0, %v695_v7 }
 0x3ff   :  { %1804 = vmatmul.msk.f32.vlgmr.msrb.gmra.mxu1 %vm66_vm0, %v824_v36 }
 0x400   :  { %v701_v39 = vsub.f32 0.0, %v697_v17 }
 0x402   :  { %v703_v42 = vsel %vm699_vm12, %v701_v39, %v697_v17 }
 0x403   :  { %v705_v43 = vadd.f32 1.0, %v703_v42 }
 0x405   :  { %v707_v9 = vmul.f32 %v705_v43, %v629_v32 }
 0x407   :  { %1798 = vmatmul.msk.f32.vlgmr.msra.gmra.mxu0 %vm66_vm0, %v707_v9  ;;  %1805 = vmatmul.msk.f32.gmra.mxu1 %vm66_vm0, %v825_v44 }
 0x40f   :  { %1799 = vmatmul.msk.f32.gmra.mxu0 %vm66_vm0, %v708_v23 }
 0x47c   :  { %v858_v60 = vpop.f32.mrf.mxu1 }
 0x47d   :  { %v859_v54 = vadd.f32 %v858_v60, %v833_v50 }
 0x47f   :  { %v2436_v55 = vadd.f32 %v868_v51, %v859_v54 }
 0x481   :  { %1816 = vmatmul.msk.f32.vlgmr.msrb.gmra.mxu3 %vm66_vm0, %v2436_v55 }
 0x484   :  { %v740_v62 = vpop.f32.mrf.mxu0  ;;  %v861_v13 = vpop.f32.mrf.mxu1 }
 0x485   :  { %v741_v1 = vadd.f32 %v740_v62, %v715_v57  ;;  %v862_v59 = vadd.f32 %v861_v13, %v833_v50 }
 0x487   :  { %v2444_v3 = vadd.f32 %v864_v63, %v741_v1  ;;  %v2446_v25 = vadd.f32 %v869_v2, %v862_v59 }
 0x489   :  { %1810 = vmatmul.msk.f32.vlgmr.msrb.gmra.mxu2 %vm66_vm0, %v2444_v3  ;;  %1817 = vmatmul.msk.f32.gmra.mxu3 %vm66_vm0, %v2446_v25 }
 0x48c   :  { %v743_v26 = vpop.f32.mrf.mxu0 }
 0x48d   :  { %v744_v19 = vadd.f32 %v743_v26, %v715_v57 }
 0x48f   :  { %v2454_v4 = vadd.f32 %v865_v18, %v744_v19  ;;  %v2013_v19 = vld [vmem:[%s2724_s1] sm:$0xff] }
 0x491   :  { %1811 = vmatmul.msk.f32.gmra.mxu2 %vm66_vm0, %v2454_v4 }
 0x504   :  { %v938_v29 = vpop.f32.mrf.mxu3 }
 0x505   :  { %v939_v5 = vadd.f32 %v2461_v28, %v938_v29 }
 0x507   :  { %1052 = vrot.lane.b32.xlu2 %v939_v5, %s2049_s15 }
 0x50c   :  { %v903_v6 = vpop.f32.mrf.mxu2  ;;  %v941_v8 = vpop.f32.mrf.mxu3 }
 0x50d   :  { %v942_v21 = vadd.f32 %v2461_v28, %v941_v8  ;;  %v2476_v46 = vadd.f32 %v2470_v22, %v903_v6 }
 0x50f   :  { %1054 = vrot.lane.b32.xlu0 %v942_v21, %s2049_s15  ;;  %v2494_v12 = vpack.i.bf16 %v939_v5, %v942_v21 }
 0x514   :  { %v906_v34 = vpop.f32.mrf.mxu2 }
 0x515   :  { %v2473_v10 = vadd.f32 %v2470_v22, %v906_v34 }
 0x517   :  { %1050 = vrot.lane.b32.xlu1 %v2473_v10, %s2048_s14  ;;  %1268 = vrot.lane.b32.xlu2 %v2473_v10, %s2049_s15  ;;  %v1895_v51 = vpack.i.bf16 %v2476_v46, %v2473_v10 }
 0x518   :  { %1048 = vrot.lane.b32.xlu0 %v2476_v46, %s2048_s14 }
 0x51f   :  { %1262 = vrot.lane.b32.xlu1 %v939_v5, %s2048_s14  ;;  %1264 = vrot.lane.b32.xlu2 %v942_v21, %s2048_s14 }
 0x520   :  { %1266 = vrot.lane.b32.xlu0 %v2476_v46, %s2049_s15 }
 0x527   :  { %946 = vrot.lane.b32.xlu1 %v939_v5, %s2047_s17  ;;  %1164 = vrot.lane.b32.xlu2 %v2473_v10, %s2047_s17 }
 0x528   :  { %948 = vrot.lane.b32.xlu0 %v942_v21, %s2047_s17 }
 0x530   :  { %1162 = vrot.lane.b32.xlu0 %v2476_v46, %s2047_s17 }
 0x538   :  { %1891 = vrot.lane.b32.xlu0 %v2494_v12, %s2050_s19 }
 0x561   :  { %v1053_v14 = vpop.permute.xlu2 %1052 }
 0x571   :  { %v1269_v20 = vpop.permute.xlu2 %1268 }
 0x579   :  { %v1265_v7 = vpop.permute.xlu2 %1264 }
 0x581   :  { %v1055_v15 = vpop.permute.xlu0 %1054  ;;  %v1165_v37 = vpop.permute.xlu2 %1164 }
 0x582   :  { %1824 = vmatpush.xpose.msk.msra.mxu2 %vm198_vm1, %v1055_v15 }
 0x586   :  { %1825 = vmatpush.xpose.msk.msra.mxu2 %vm198_vm1, %v1053_v14 }
 0x589   :  { %v1051_v16 = vpop.permute.xlu1 %1050 }
 0x58a   :  { %1836 = vmatpush.xpose.msk.msrb.mxu2 %vm198_vm1, %v1269_v20  ;;  %v1049_v52 = vpop.permute.xlu0 %1048  ;;  %v2014_v20 = vld [vmem:[%s2724_s1 + $0x8] sm:$0xff] }
 0x58b   :  { %1826 = vmatmul.msk.f32.vlgmr.msra.gmra.mxu2 %vm198_vm1, %v1049_v52 }
 0x591   :  { %v1263_v33 = vpop.permute.xlu1 %1262 }
 0x592   :  { %v1267_v30 = vpop.permute.xlu0 %1266 }
 0x593   :  { %1827 = vmatmul.msk.f32.gmra.mxu2 %vm198_vm1, %v1051_v16 }
 0x594   :  { %1837 = vmatpush.xpose.msk.msrb.mxu2 %vm198_vm1, %v1267_v30 }
 0x599   :  { %v947_v17 = vpop.permute.xlu1 %946 }
 0x59a   :  { %v949_v36 = vpop.permute.xlu0 %948 }
 0x59b   :  { %1818 = vmatpush.xpose.msk.msrb.mxu0 %vm198_vm1, %v949_v36  ;;  %1838 = vmatmul.msk.f32.vlgmr.msrb.gmra.mxu2 %vm198_vm1, %v1263_v33 }
 0x59f   :  { %1819 = vmatpush.xpose.msk.msrb.mxu0 %vm198_vm1, %v947_v17 }
 0x5a2   :  { %1820 = vmatmul.msk.f32.vlgmr.msrb.gmra.mxu0 %vm198_vm1, %v2476_v46  ;;  %v1163_v38 = vpop.permute.xlu0 %1162 }
 0x5a3   :  { %1830 = vmatpush.xpose.msk.msra.mxu0 %vm198_vm1, %v1165_v37  ;;  %1839 = vmatmul.msk.f32.gmra.mxu2 %vm198_vm1, %v1265_v7 }
 0x5a7   :  { %1831 = vmatpush.xpose.msk.msra.mxu0 %vm198_vm1, %v1163_v38  ;;  %v2015_v38 = vld [vmem:[%s2724_s1 + $0x10] sm:$0xff] }
 0x5aa   :  { %1821 = vmatmul.msk.f32.gmra.mxu0 %vm198_vm1, %v2473_v10  ;;  %v1892_v39 = vpop.permute.xlu0 %1891 }
 0x5ab   :  { %v1893_v42 = vunpack.i.l.bf16 %v1892_v39  ;;  %v1894_v35 = vunpack.i.h.bf16 %v1892_v39 }
 0x5ad   :  { %1141 = vmatpush.msra.mxu3 %v1893_v42 }
 0x5af   :  { %1142 = vmatpush.msra.mxu3 %v1894_v35 }
 0x5b2   :  { %1832 = vmatmul.msk.f32.vlgmr.msra.gmra.mxu0 %vm198_vm1, %v939_v5 }
 0x5ba   :  { %1833 = vmatmul.msk.f32.gmra.mxu0 %vm198_vm1, %v942_v21 }
 0x60e   :  { %v1081_v41 = vpop.f32.mrf.mxu2 }
 0x60f   :  { %v1087_v32 = vsel %vm232_vm2, %v1081_v41, -1e+30 }
 0x610   :  { %v1089_v43 = vsel %vm198_vm1, %v1087_v32, -inf }
 0x611   :  { %1090 = vmax.xlane.f32.xlu1 %v1089_v43 }
 0x616   :  { %v1084_v40 = vpop.f32.mrf.mxu2 }
 0x617   :  { %v1088_v9 = vsel %vm233_vm4, %v1084_v40, -1e+30 }
 0x618   :  { %v1092_v44 = vsel %vm198_vm1, %v1088_v9, -inf }
 0x619   :  { %1093 = vmax.xlane.f32.xlu2 %v1092_v44 }
 0x61e   :  { %v1295_v45 = vpop.f32.mrf.mxu2 }
 0x61f   :  { %v1301_v47 = vsel %vm448_vm3, %v1295_v45, -1e+30  ;;  %v977_v58 = vpop.f32.mrf.mxu0 }
 0x620   :  { %v983_v23 = vsel %vm232_vm2, %v977_v58, -1e+30  ;;  %v1303_v53 = vsel %vm198_vm1, %v1301_v47, -inf  ;;  %v2016_v58 = vld [vmem:[%s2724_s1 + $0x18] sm:$0xff] }
 0x621   :  { %1304 = vmax.xlane.f32.xlu0 %v1303_v53  ;;  %v985_v31 = vsel %vm198_vm1, %v983_v23, -inf }
 0x622   :  { %986 = vmax.xlane.f32.xlu1 %v985_v31 }
 0x626   :  { %v1298_v27 = vpop.f32.mrf.mxu2 }
 0x627   :  { %v1302_v24 = vsel %vm449_vm5, %v1298_v27, -1e+30  ;;  %v980_v48 = vpop.f32.mrf.mxu0 }
 0x628   :  { %v984_v49 = vsel %vm233_vm4, %v980_v48, -1e+30  ;;  %v1306_v50 = vsel %vm198_vm1, %v1302_v24, -inf }
 0x629   :  { %v988_v60 = vsel %vm198_vm1, %v984_v49, -inf }
 0x62a   :  { %1307 = vmax.xlane.f32.xlu1 %v1306_v50  ;;  %989 = vmax.xlane.f32.xlu0 %v988_v60 }
 0x62f   :  { %v1191_v56 = vpop.f32.mrf.mxu0 }
 0x630   :  { %v2538_v54 = vsel %vm448_vm3, %v1191_v56, -1e+30 }
 0x631   :  { %1896 = vrot.lane.b32.xlu2 %v1895_v51, %s2050_s19  ;;  %v1199_v0 = vsel %vm198_vm1, %v2538_v54, -inf }
 0x632   :  { %1200 = vmax.xlane.f32.xlu0 %v1199_v0 }
 0x637   :  { %v1194_v57 = vpop.f32.mrf.mxu0 }
 0x638   :  { %v2548_v62 = vsel %vm449_vm5, %v1194_v57, -1e+30 }
 0x639   :  { %v1202_v61 = vsel %vm198_vm1, %v2548_v62, -inf }
 0x643   :  { %1901 = vrot.lane.b32.xlu1 %v2494_v12, %s2051_s28 }
 0x646   :  { %1906 = vrot.lane.b32.xlu0 %v1895_v51, %s2051_s28 }
 0x65a   :  { %1203 = vmax.xlane.f32.xlu2 %v1202_v61 }
 0x684   :  { %v1091_v63 = vpop.xlane.xlu1 %1090 }
 0x685   :  { %v1095_v1 = vsub.f32 %v1087_v32, %v1091_v63 }
 0x687   :  { %v1097_v13 = vmul.f32 1.442695, %v1095_v1 }
 0x689   :  { %1965 = vpow2.f32 %v1097_v13 }
 0x68c   :  { %v1094_v2 = vpop.xlane.xlu2 %1093 }
 0x68d   :  { %v1096_v59 = vsub.f32 %v1088_v9, %v1094_v2 }
 0x68f   :  { %v1966_v26 = vpop.eup %1965  ;;  %v1099_v18 = vmul.f32 1.442695, %v1096_v59 }
 0x690   :  { %v1101_v29 = vmul.f32 %v2013_v19, %v1966_v26 }
 0x691   :  { %1967 = vpow2.f32 %v1099_v18 }
 0x692   :  { %1828 = vmatmul.msk.f32.vlgmr.msra.gmra.mxu3 %vm198_vm1, %v1101_v29  ;;  %v1103_v11 = vsel %vm198_vm1, %v1101_v29, 0.0 }
 0x693   :  { %1104 = vadd.xlane.f32.xlu1 %v1103_v11 }
 0x694   :  { %v1897_v5 = vpop.permute.xlu2 %1896  ;;  %v1305_v6 = vpop.xlane.xlu0 %1304 }
 0x695   :  { %v1898_v8 = vunpack.i.l.bf16 %v1897_v5  ;;  %v1309_v21 = vsub.f32 %v1301_v47, %v1305_v6  ;;  %v987_v34 = vpop.xlane.xlu1 %986  ;;  %v1899_v12 = vunpack.i.h.bf16 %v1897_v5 }
 0x696   :  { %v991_v10 = vsub.f32 %v983_v23, %v987_v34 }
 0x697   :  { %v1968_v46 = vpop.eup %1967  ;;  %v1311_v14 = vmul.f32 1.442695, %v1309_v21  ;;  %1355 = vmatpush.msrb.mxu3 %v1898_v8 }
 0x698   :  { %v993_v15 = vmul.f32 1.442695, %v991_v10  ;;  %v1102_v16 = vmul.f32 %v2014_v20, %v1968_v46 }
 0x699   :  { %1969 = vpow2.f32 %v1311_v14  ;;  %1356 = vmatpush.msrb.mxu3 %v1899_v12 }
 0x69a   :  { %1971 = vpow2.f32 %v993_v15  ;;  %1829 = vmatmul.msk.f32.gmra.mxu3 %vm198_vm1, %v1102_v16  ;;  %v1106_v52 = vsel %vm198_vm1, %v1102_v16, 0.0 }
 0x69b   :  { %1107 = vadd.xlane.f32.xlu2 %v1106_v52 }
 0x69d   :  { %v1308_v30 = vpop.xlane.xlu1 %1307  ;;  %v990_v33 = vpop.xlane.xlu0 %989 }
 0x69e   :  { %v1310_v7 = vsub.f32 %v1302_v24, %v1308_v30  ;;  %v992_v36 = vsub.f32 %v984_v49, %v990_v33  ;;  %v2017_v30 = vld [vmem:[%s2728_s5] ss:$0 sm:$0xff] }
 0x69f   :  { %v1970_v17 = vpop.eup %1969 }
 0x6a0   :  { %v1972_v37 = vpop.eup %1971  ;;  %v1315_v39 = vmul.f32 %v2015_v38, %v1970_v17  ;;  %v1313_v42 = vmul.f32 1.442695, %v1310_v7  ;;  %v995_v35 = vmul.f32 1.442695, %v992_v36 }
 0x6a1   :  { %v997_v41 = vmul.f32 %v2013_v19, %v1972_v37 }
 0x6a2   :  { %1973 = vpow2.f32 %v1313_v42  ;;  %1840 = vmatmul.msk.f32.vlgmr.msrb.gmra.mxu3 %vm198_vm1, %v1315_v39  ;;  %v1317_v32 = vsel %vm198_vm1, %v1315_v39, 0.0 }
 0x6a3   :  { %1975 = vpow2.f32 %v995_v35  ;;  %1318 = vadd.xlane.f32.xlu0 %v1317_v32  ;;  %v999_v43 = vsel %vm198_vm1, %v997_v41, 0.0 }
 0x6a4   :  { %1000 = vadd.xlane.f32.xlu1 %v999_v43 }
 0x6a5   :  { %v1201_v40 = vpop.xlane.xlu0 %1200 }
 0x6a6   :  { %v1205_v9 = vsub.f32 %v2538_v54, %v1201_v40 }
 0x6a8   :  { %v1974_v44 = vpop.eup %1973  ;;  %v1207_v45 = vmul.f32 1.442695, %v1205_v9 }
 0x6a9   :  { %v1976_v47 = vpop.eup %1975  ;;  %v1316_v23 = vmul.f32 %v2016_v58, %v1974_v44 }
 0x6aa   :  { %1977 = vpow2.f32 %v1207_v45  ;;  %v998_v53 = vmul.f32 %v2014_v20, %v1976_v47 }
 0x6ab   :  { %1841 = vmatmul.msk.f32.gmra.mxu3 %vm198_vm1, %v1316_v23  ;;  %v1320_v31 = vsel %vm198_vm1, %v1316_v23, 0.0  ;;  %v1460_v23 = vld [vmem:[#allocation2 + $0x58] sm:$0xff] }
 0x6ac   :  { %1321 = vadd.xlane.f32.xlu2 %v1320_v31  ;;  %v1002_v27 = vsel %vm198_vm1, %v998_v53, 0.0  ;;  %1483 = vmatpush.msrb.mxu0 %v1460_v23 }
 0x6ad   :  { %1003 = vadd.xlane.f32.xlu1 %v1002_v27 }
 0x6b0   :  { %v1978_v24 = vpop.eup %1977 }
 0x6b1   :  { %v1211_v48 = vmul.f32 %v2015_v38, %v1978_v24 }
 0x6b3   :  { %v1213_v49 = vsel %vm198_vm1, %v1211_v48, 0.0 }
 0x6b4   :  { %1214 = vadd.xlane.f32.xlu2 %v1213_v49 }
 0x6b5   :  { %v1902_v50 = vpop.permute.xlu1 %1901 }
 0x6b6   :  { %v1903_v60 = vunpack.i.l.bf16 %v1902_v50  ;;  %v1904_v56 = vunpack.i.h.bf16 %v1902_v50  ;;  %v1459_v50 = vld [vmem:[#allocation2 + $0x50] sm:$0xff] }
 0x6b7   :  { %1484 = vmatpush.msrb.mxu0 %v1459_v50 }
 0x6b8   :  { %1037 = vmatpush.msra.mxu1 %v1903_v60  ;;  %v1907_v51 = vpop.permute.xlu0 %1906 }
 0x6b9   :  { %v1908_v54 = vunpack.i.l.bf16 %v1907_v51  ;;  %v1909_v0 = vunpack.i.h.bf16 %v1907_v51 }
 0x6ba   :  { %1038 = vmatpush.msra.mxu1 %v1904_v56  ;;  %v1458_v56 = vld [vmem:[#allocation2 + $0x48] sm:$0xff] }
 0x6bb   :  { %1822 = vmatmul.msk.f32.vlgmr.msra.gmra.mxu1 %vm198_vm1, %v997_v41  ;;  %1485 = vmatpush.msrb.mxu0 %v1458_v56 }
 0x6bc   :  { %1251 = vmatpush.msrb.mxu1 %v1908_v54 }
 0x6be   :  { %1252 = vmatpush.msrb.mxu1 %v1909_v0 }
 0x6c3   :  { %1823 = vmatmul.msk.f32.gmra.mxu1 %vm198_vm1, %v998_v53 }
 0x6cb   :  { %1834 = vmatmul.msk.f32.vlgmr.msrb.gmra.mxu1 %vm198_vm1, %v1211_v48 }
 0x6cd   :  { %v1204_v57 = vpop.xlane.xlu2 %1203 }
 0x6ce   :  { %v1206_v61 = vsub.f32 %v2548_v62, %v1204_v57 }
 0x6d0   :  { %v1209_v63 = vmul.f32 1.442695, %v1206_v61  ;;  %v1457_v61 = vld [vmem:[#allocation2 + $0x40] sm:$0xff] }
 0x6d1   :  { %1486 = vmatpush.msrb.mxu0 %v1457_v61 }
 0x6d2   :  { %1979 = vpow2.f32 %v1209_v63 }
 0x6d8   :  { %v1980_v1 = vpop.eup %1979 }
 0x6d9   :  { %v1212_v13 = vmul.f32 %v2016_v58, %v1980_v1 }
 0x6db   :  { %1835 = vmatmul.msk.f32.gmra.mxu1 %vm198_vm1, %v1212_v13  ;;  %v1216_v2 = vsel %vm198_vm1, %v1212_v13, 0.0 }
 0x6dc   :  { %1217 = vadd.xlane.f32.xlu0 %v1216_v2 }
 0x706   :  { %v1105_v59 = vpop.xlane.xlu1 %1104 }
 0x707   :  { %vm1109_vm2 = vcmp.gt.f32.partialorder %v1105_v59, 0.0 }
 0x708   :  { %v1111_v26 = vsel %vm1109_vm2, %v1105_v59, 1.0 }
 0x709   :  { %1981 = vrcp.f32 %v1111_v26 }
 0x70e   :  { %v1108_v18 = vpop.xlane.xlu2 %1107 }
 0x70f   :  { %vm1110_vm3 = vcmp.gt.f32.partialorder %v1108_v18, 0.0  ;;  %v1982_v29 = vpop.eup %1981 }
 0x710   :  { %v1112_v19 = vsel %vm1110_vm3, %v1108_v18, 1.0 }
 0x711   :  { %1983 = vrcp.f32 %v1112_v19 }
 0x715   :  { %v1144_v11 = vpop.f32.mrf.mxu3 }
 0x716   :  { %v1150_v5 = vmul.f32 %v1982_v29, %v1144_v11  ;;  %v1319_v62 = vpop.xlane.xlu0 %1318 }
 0x717   :  { %vm1323_vm4 = vcmp.gt.f32.partialorder %v1319_v62, 0.0  ;;  %v1984_v8 = vpop.eup %1983  ;;  %v1001_v33 = vpop.xlane.xlu1 %1000 }
 0x718   :  { %1154 = vrot.lane.b32.xlu2 %v1150_v5, %s2052_s29  ;;  %v1325_v6 = vsel %vm1323_vm4, %v1319_v62, 1.0  ;;  %vm1005_vm14 = vcmp.gt.f32.partialorder %v1001_v33, 0.0 }
 0x719   :  { %1985 = vrcp.f32 %v1325_v6  ;;  %v1007_v7 = vsel %vm1005_vm14, %v1001_v33, 1.0 }
 0x71d   :  { %v1147_v21 = vpop.f32.mrf.mxu3 }
 0x71e   :  { %v1151_v34 = vmul.f32 %v1984_v8, %v1147_v21 }
 0x71f   :  { %v1322_v10 = vpop.xlane.xlu2 %1321  ;;  %v1986_v46 = vpop.eup %1985 }
 0x720   :  { %1156 = vrot.lane.b32.xlu0 %v1151_v34, %s2052_s29  ;;  %vm1324_vm5 = vcmp.gt.f32.partialorder %v1322_v10, 0.0  ;;  %v1004_v44 = vpop.xlane.xlu1 %1003 }
 0x721   :  { %v1326_v12 = vsel %vm1324_vm5, %v1322_v10, 1.0  ;;  %vm1006_vm6 = vcmp.gt.f32.partialorder %v1004_v44, 0.0 }
 0x722   :  { %1987 = vrcp.f32 %v1326_v12  ;;  %v1008_v27 = vsel %vm1006_vm6, %v1004_v44, 1.0 }
 0x723   :  { %1989 = vrcp.f32 %v1007_v7 }
 0x725   :  { %v1358_v14 = vpop.f32.mrf.mxu3 }
 0x726   :  { %v1364_v15 = vmul.f32 %v1986_v46, %v1358_v14 }
 0x728   :  { %1368 = vrot.lane.b32.xlu1 %v1364_v15, %s2052_s29  ;;  %1462 = vrot.lane.b32.xlu0 %v2470_v22, %s2053_s30  ;;  %v1988_v20 = vpop.eup %1987  ;;  %v1215_v22 = vpop.xlane.xlu2 %1214 }
 0x729   :  { %v1990_v17 = vpop.eup %1989  ;;  %vm1219_vm11 = vcmp.gt.f32.partialorder %v1215_v22, 0.0 }
 0x72a   :  { %v1221_v26 = vsel %vm1219_vm11, %v1215_v22, 1.0 }
 0x72e   :  { %v1361_v16 = vpop.f32.mrf.mxu3 }
 0x72f   :  { %v1365_v52 = vmul.f32 %v1988_v20, %v1361_v16 }
 0x730   :  { %1580 = vrot.lane.b32.xlu1 %v2461_v28, %s2053_s30  ;;  %1717 = vrot.lane.b32.xlu0 %v2017_v30, %s2053_s30 }
 0x731   :  { %1370 = vrot.lane.b32.xlu2 %v1365_v52, %s2052_s29 }
 0x738   :  { %v1040_v36 = vpop.f32.mrf.mxu1 }
 0x739   :  { %1712 = vrot.lane.b32.xlu2 %v2017_v30, %s2051_s28  ;;  %v1046_v37 = vmul.f32 %v1990_v17, %v1040_v36 }
 0x740   :  { %v1043_v42 = vpop.f32.mrf.mxu1 }
 0x748   :  { %v1254_v9 = vpop.f32.mrf.mxu1 }
 0x74f   :  { %v1218_v41 = vpop.xlane.xlu0 %1217 }
 0x750   :  { %vm1220_vm15 = vcmp.gt.f32.partialorder %v1218_v41, 0.0 }
 0x751   :  { %v1222_v40 = vsel %vm1220_vm15, %v1218_v41, 1.0 }
 0x758   :  { %v1257_v24 = vpop.f32.mrf.mxu1 }
 0x772   :  { %v1155_v38 = vpop.permute.xlu2 %1154 }
 0x773   :  { %v2596_v28 = vsel %vm198_vm1, %v1046_v37, %v1155_v38 }
 0x774   :  { %v2599_v39 = vmul.f32 0.70710677, %v2596_v28 }
 0x776   :  { %v1380_v35 = vand.u32 2147483647, %v2599_v39  ;;  %vm1446_vm3 = vcmp.lt.f32.partialorder %v2599_v39, 0.0 }
 0x778   :  { %v1382_v32 = vmul.f32 0.3275911, %v1380_v35  ;;  %v1434_v1 = vmul.f32 %v1380_v35, %v1380_v35 }
 0x77a   :  { %v1384_v43 = vadd.f32 1.0, %v1382_v32  ;;  %v1436_v11 = vsub.f32 0.0, %v1434_v1 }
 0x77c   :  { %1991 = vrcp.f32 %v1384_v43  ;;  %v1397_v53 = vand.u32 2147483648, %v1384_v43  ;;  %v1395_v49 = vand.u32 2147483647, %v1384_v43  ;;  %vm1391_vm8 = vweird.f32 %v1384_v43 }
 0x77d   :  { %1993 = vrcp.f32 %v1222_v40  ;;  %v1438_v46 = vmul.f32 1.442695, %v1436_v11 }
 0x77e   :  { %1995 = vrcp.f32 %v1008_v27  ;;  %v1398_v54 = vor.u32 1.1754944e-38, %v1397_v53  ;;  %vm1396_vm10 = vcmp.eq.f32.partialorder %v1395_v49, 8.507059e+37 }
 0x77f   :  { %1997 = vrcp.f32 %v1221_v26 }
 0x782   :  { %v1992_v45 = vpop.eup %1991 }
 0x783   :  { %v1387_v47 = vmul.f32 %v1992_v45, %v1384_v43  ;;  %v1994_v31 = vpop.eup %1993  ;;  %vm1392_vm7 = vweird.f32 %v1992_v45 }
 0x784   :  { %v1261_v51 = vmul.f32 %v1994_v31, %v1257_v24  ;;  %vm1393_vm9 = vmor %vm1391_vm8, %vm1392_vm7  ;;  %v1996_v29 = vpop.eup %1995 }
 0x785   :  { %v1388_v58 = vsub.f32 1.0, %v1387_v47  ;;  %v1047_v5 = vmul.f32 %v1996_v29, %v1043_v42  ;;  %v1998_v16 = vpop.eup %1997 }
 0x786   :  { %v1260_v30 = vmul.f32 %v1998_v16, %v1254_v9 }
 0x787   :  { %v1389_v48 = vmul.f32 %v1992_v45, %v1388_v58 }
 0x789   :  { %v1390_v60 = vadd.f32 %v1992_v45, %v1389_v48 }
 0x78b   :  { %v1394_v0 = vsel %vm1393_vm9, %v1992_v45, %v1390_v60  ;;  %v1371_v57 = vpop.permute.xlu2 %1370 }
 0x78c   :  { %v1399_v63 = vsel %vm1396_vm10, %v1398_v54, %v1394_v0  ;;  %v2603_v13 = vsel %vm198_vm1, %v1261_v51, %v1371_v57  ;;  %v1376_v51 = vmul.f32 0.5, %v2596_v28 }
 0x78d   :  { %v1416_v2 = vmul.f32 1.0614054, %v1399_v63  ;;  %v2606_v59 = vmul.f32 0.70710677, %v2603_v13 }
 0x78f   :  { %v1842_v18 = vadd.f32 -1.4531521, %v1416_v2  ;;  %v2609_v19 = vand.u32 2147483647, %v2606_v59 }
 0x791   :  { %v1420_v62 = vmul.f32 %v1842_v18, %v1399_v63  ;;  %v1501_v6 = vmul.f32 0.3275911, %v2609_v19 }
 0x792   :  { %v1157_v8 = vpop.permute.xlu0 %1156 }
 0x793   :  { %v1422_v21 = vadd.f32 1.4214138, %v1420_v62  ;;  %v1503_v34 = vadd.f32 1.0, %v1501_v6  ;;  %v2613_v10 = vsel %vm198_vm1, %v1047_v5, %v1157_v8  ;;  %v1578_v8 = vld [vmem:[#allocation2 + $0x78] sm:$0xff] }
 0x794   :  { %v2616_v12 = vmul.f32 0.70710677, %v2613_v10  ;;  %1601 = vmatpush.msra.mxu1 %v1578_v8 }
 0x795   :  { %v1424_v14 = vmul.f32 %v1422_v21, %v1399_v63  ;;  %1999 = vrcp.f32 %v1503_v34  ;;  %v1530_v40 = vand.u32 2147483648, %v1503_v34  ;;  %v1528_v9 = vand.u32 2147483647, %v1503_v34 }
 0x796   :  { %v1381_v15 = vand.u32 2147483647, %v2616_v12  ;;  %2001 = vpow2.f32 %v1438_v46  ;;  %vm1524_vm13 = vweird.f32 %v1503_v34  ;;  %v1577_v46 = vld [vmem:[#allocation2 + $0x70] sm:$0xff]  ;;  %vm1447_vm11 = vcmp.lt.f32.partialorder %v2616_v12, 0.0 }
 0x797   :  { %v1844_v20 = vadd.f32 -0.28449672, %v1424_v14  ;;  %v1531_v27 = vor.u32 1.1754944e-38, %v1530_v40  ;;  %vm1529_vm4 = vcmp.eq.f32.partialorder %v1528_v9, 8.507059e+37  ;;  %1602 = vmatpush.msra.mxu1 %v1577_v46 }
 0x798   :  { %v1383_v52 = vmul.f32 0.3275911, %v1381_v15  ;;  %v1435_v11 = vmul.f32 %v1381_v15, %v1381_v15 }
 0x799   :  { %v1428_v33 = vmul.f32 %v1844_v20, %v1399_v63 }
 0x79a   :  { %v1385_v7 = vadd.f32 1.0, %v1383_v52  ;;  %v1369_v22 = vpop.permute.xlu1 %1368  ;;  %v1437_v20 = vsub.f32 0.0, %v1435_v11 }
 0x79b   :  { %v2000_v36 = vpop.eup %1999  ;;  %v1430_v17 = vadd.f32 0.2548296, %v1428_v33  ;;  %v2620_v37 = vsel %vm198_vm1, %v1260_v30, %v1369_v22  ;;  %v1575_v22 = vld [vmem:[#allocation2 + $0x60] sm:$0xff] }
 0x79c   :  { %v1520_v38 = vmul.f32 %v2000_v36, %v1503_v34  ;;  %2003 = vrcp.f32 %v1385_v7  ;;  %v2002_v35 = vpop.eup %2001  ;;  %v2623_v32 = vmul.f32 0.70710677, %v2620_v37  ;;  %vm1525_vm12 = vweird.f32 %v2000_v36 }
 0x79d   :  { %v1432_v42 = vmul.f32 %v1430_v17, %v1399_v63  ;;  %vm1526_vm2 = vmor %vm1524_vm13, %vm1525_vm12  ;;  %v1412_v0 = vand.u32 2147483648, %v1385_v7  ;;  %v1410_v61 = vand.u32 2147483647, %v1385_v7  ;;  %vm1406_vm14 = vweird.f32 %v1385_v7 }
 0x79e   :  { %v1521_v41 = vsub.f32 1.0, %v1520_v38  ;;  %v2626_v45 = vand.u32 2147483647, %v2623_v32  ;;  %v1553_v38 = vmul.f32 %v2609_v19, %v2609_v19  ;;  %vm1564_vm12 = vcmp.lt.f32.partialorder %v2623_v32, 0.0 }
 0x79f   :  { %v1442_v43 = vmul.f32 %v2002_v35, %v1432_v42  ;;  %v1413_v26 = vor.u32 1.1754944e-38, %v1412_v0  ;;  %vm1411_vm6 = vcmp.eq.f32.partialorder %v1410_v61, 8.507059e+37  ;;  %v1440_v42 = vmul.f32 1.442695, %v1437_v20 }
 0x7a0   :  { %v1522_v44 = vmul.f32 %v2000_v36, %v1521_v41  ;;  %v1500_v53 = vmul.f32 0.3275911, %v2626_v45  ;;  %v1494_v20 = vmul.f32 0.5, %v2620_v37  ;;  %vm1565_vm13 = vcmp.lt.f32.partialorder %v2606_v59, 0.0 }
 0x7a1   :  { %v1444_v47 = vsub.f32 1.0, %v1442_v43  ;;  %v1612_v32 = vmul.f32 0.26894143, %v2444_v3  ;;  %v43_v3 = vld [vmem:[%s2724_s1 + $0x20] sm:$0xff] }
 0x7a2   :  { %v2004_v58 = vpop.eup %2003  ;;  %v1523_v23 = vadd.f32 %v2000_v36, %v1522_v44  ;;  %v1502_v48 = vadd.f32 1.0, %v1500_v53  ;;  %v1552_v44 = vmul.f32 %v2626_v45, %v2626_v45 }
 0x7a3   :  { %v1448_v31 = vsub.f32 0.0, %v1444_v47  ;;  %v1402_v24 = vmul.f32 %v2004_v58, %v1385_v7  ;;  %vm1407_vm5 = vweird.f32 %v2004_v58  ;;  %v1576_v7 = vld [vmem:[#allocation2 + $0x68] sm:$0xff] }
 0x7a4   :  { %v1527_v49 = vsel %vm1526_vm2, %v2000_v36, %v1523_v23  ;;  %2005 = vrcp.f32 %v1502_v48  ;;  %vm1408_vm15 = vmor %vm1406_vm14, %vm1407_vm5  ;;  %v1515_v16 = vand.u32 2147483648, %v1502_v48  ;;  %v1513_v30 = vand.u32 2147483647, %v1502_v48  ;;  %1603 = vmatpush.msra.mxu1 %v1576_v7 }
 0x7a5   :  { %v1450_v50 = vsel %vm1446_vm3, %v1448_v31, %v1444_v47  ;;  %v1403_v60 = vsub.f32 1.0, %v1402_v24  ;;  %v2630_v56 = vsel %vm1529_vm4, %v1531_v27, %v1527_v49  ;;  %vm1509_vm8 = vweird.f32 %v1502_v48 }
 0x7a6   :  { %v1452_v54 = vadd.f32 1.0, %v1450_v50  ;;  %v1535_v63 = vmul.f32 1.0614054, %v2630_v56  ;;  %v1516_v35 = vor.u32 1.1754944e-38, %v1515_v16  ;;  %1604 = vmatpush.msra.mxu1 %v1575_v22  ;;  %vm1514_vm10 = vcmp.eq.f32.partialorder %v1513_v30, 8.507059e+37  ;;  %v1463_v22 = vpop.permute.xlu0 %1462 }
 0x7a7   :  { %v1404_v57 = vmul.f32 %v2004_v58, %v1403_v60  ;;  %v1555_v23 = vsub.f32 0.0, %v1553_v38  ;;  %2007 = vpow2.f32 %v1440_v42  ;;  %v1554_v27 = vsub.f32 0.0, %v1552_v44 }
 0x7a8   :  { %v1454_v1 = vmul.f32 %v1452_v54, %v1376_v51  ;;  %v1849_v39 = vadd.f32 -1.4531521, %v1535_v63  ;;  %v1613_v38 = vmul.f32 0.26894143, %v2454_v4  ;;  %v55_v4 = vld [vmem:[%s2725_s2 + $0x50] sm:$0xff] }
 0x7a9   :  { %v1405_v2 = vadd.f32 %v2004_v58, %v1404_v57  ;;  %v1558_v49 = vmul.f32 1.442695, %v1555_v23  ;;  %v1556_v54 = vmul.f32 1.442695, %v1554_v27  ;;  %v52_v27 = vld [vmem:[%s2725_s2 + $0x38] sm:$0xff] }
 0x7aa   :  { %1846 = vmatmul.msk.f32.vlgmr.msrb.gmra.mxu0 %vm66_vm0, %v1454_v1  ;;  %v1539_v28 = vmul.f32 %v1849_v39, %v2630_v56  ;;  %v2006_v29 = vpop.eup %2005 }
 0x7ab   :  { %v1409_v18 = vsel %vm1408_vm15, %v2004_v58, %v1405_v2  ;;  %v1505_v62 = vmul.f32 %v2006_v29, %v1502_v48  ;;  %vm1510_vm7 = vweird.f32 %v2006_v29  ;;  %2009 = vpow2.f32 %v1558_v49  ;;  %v59_v49 = vld [vmem:[%s2725_s2 + $0x70] sm:$0xff] }
 0x7ac   :  { %v1414_v5 = vsel %vm1411_vm6, %v1413_v26, %v1409_v18  ;;  %v1541_v14 = vadd.f32 1.4214138, %v1539_v28  ;;  %vm1511_vm9 = vmor %vm1509_vm8, %vm1510_vm7  ;;  %2011 = vpow2.f32 %v1556_v54  ;;  %v57_v54 = vld [vmem:[%s2725_s2 + $0x60] sm:$0xff] }
 0x7ad   :  { %v1417_v6 = vmul.f32 1.0614054, %v1414_v5  ;;  %v1506_v21 = vsub.f32 1.0, %v1505_v62  ;;  %v2008_v51 = vpop.eup %2007 }
 0x7ae   :  { %v1543_v17 = vmul.f32 %v1541_v14, %v2630_v56 }
 0x7af   :  { %v1843_v34 = vadd.f32 -1.4531521, %v1417_v6  ;;  %v1507_v52 = vmul.f32 %v2006_v29, %v1506_v21 }
 0x7b0   :  { %v1851_v58 = vadd.f32 -0.28449672, %v1543_v17 }
 0x7b1   :  { %v1421_v33 = vmul.f32 %v1843_v34, %v1414_v5  ;;  %v1508_v15 = vadd.f32 %v2006_v29, %v1507_v52  ;;  %v2010_v28 = vpop.eup %2009 }
 0x7b2   :  { %v1547_v48 = vmul.f32 %v1851_v58, %v2630_v56  ;;  %v2012_v6 = vpop.eup %2011 }
 0x7b3   :  { %v1423_v36 = vadd.f32 1.4214138, %v1421_v33  ;;  %v1512_v41 = vsel %vm1511_vm9, %v2006_v29, %v1508_v15  ;;  %v1377_v29 = vmul.f32 0.5, %v2613_v10  ;;  %v1495_v33 = vmul.f32 0.5, %v2603_v13  ;;  %v56_v13 = vld [vmem:[%s2725_s2 + $0x58] sm:$0xff] }
 0x7b4   :  { %v1517_v40 = vsel %vm1514_vm10, %v1516_v35, %v1512_v41  ;;  %v1549_v45 = vadd.f32 0.2548296, %v1547_v48  ;;  %v1581_v35 = vpop.permute.xlu1 %1580  ;;  %v60_v48 = vld [vmem:[%s2725_s2 + $0x78] sm:$0xff] }
 0x7b5   :  { %v1425_v43 = vmul.f32 %v1423_v36, %v1414_v5  ;;  %v1534_v9 = vmul.f32 1.0614054, %v1517_v40  ;;  %1735 = vmatpush.msra.mxu0 %v60_v48 }
 0x7b6   :  { %v1551_v39 = vmul.f32 %v1549_v45, %v2630_v56  ;;  %v1713_v45 = vpop.permute.xlu2 %1712 }
 0x7b7   :  { %v1845_v47 = vadd.f32 -0.28449672, %v1425_v43  ;;  %v1848_v53 = vadd.f32 -1.4531521, %v1534_v9  ;;  %v54_v43 = vld [vmem:[%s2725_s2 + $0x48] sm:$0xff]  ;;  %v53_v9 = vld [vmem:[%s2725_s2 + $0x40] sm:$0xff]  ;;  %1736 = vmatpush.msra.mxu0 %v59_v49 }
 0x7b8   :  { %v1561_v62 = vmul.f32 %v2010_v28, %v1551_v39  ;;  %v1718_v39 = vpop.permute.xlu0 %1717 }
 0x7b9   :  { %v1429_v31 = vmul.f32 %v1845_v47, %v1414_v5  ;;  %v1538_v19 = vmul.f32 %v1848_v53, %v1517_v40  ;;  %v1617_v53 = vmul.f32 0.26894143, %v2446_v25  ;;  %v51_v25 = vld [vmem:[%s2725_s2 + $0x30] sm:$0xff] }
 0x7ba   :  { %v1563_v46 = vsub.f32 1.0, %v1561_v62 }
 0x7bb   :  { %v1431_v24 = vadd.f32 0.2548296, %v1429_v31  ;;  %v1540_v50 = vadd.f32 1.4214138, %v1538_v19  ;;  %v50_v19 = vld [vmem:[%s2725_s2 + $0x28] sm:$0xff] }
 0x7bc   :  { %v1567_v12 = vsub.f32 0.0, %v1563_v46 }
 0x7bd   :  { %v1433_v60 = vmul.f32 %v1431_v24, %v1414_v5  ;;  %v1542_v0 = vmul.f32 %v1540_v50, %v1517_v40  ;;  %v49_v24 = vld [vmem:[%s2725_s2 + $0x20] sm:$0xff]  ;;  %v58_v50 = vld [vmem:[%s2725_s2 + $0x68] sm:$0xff] }
 0x7be   :  { %v1569_v52 = vsel %vm1565_vm13, %v1567_v12, %v1563_v46  ;;  %1737 = vmatpush.msra.mxu0 %v58_v50 }
 0x7bf   :  { %v1443_v57 = vmul.f32 %v2008_v51, %v1433_v60  ;;  %v1850_v61 = vadd.f32 -0.28449672, %v1542_v0  ;;  %v1571_v30 = vadd.f32 1.0, %v1569_v52 }
 0x7c0   :  { %1738 = vmatpush.msra.mxu0 %v57_v54 }
 0x7c1   :  { %v1445_v63 = vsub.f32 1.0, %v1443_v57  ;;  %v1546_v1 = vmul.f32 %v1850_v61, %v1517_v40  ;;  %v1573_v7 = vmul.f32 %v1571_v30, %v1495_v33 }
 0x7c3   :  { %v1449_v2 = vsub.f32 0.0, %v1445_v63  ;;  %v1548_v26 = vadd.f32 0.2548296, %v1546_v1 }
 0x7c5   :  { %v1451_v18 = vsel %vm1447_vm11, %v1449_v2, %v1445_v63  ;;  %v1550_v5 = vmul.f32 %v1548_v26, %v1517_v40  ;;  %v1616_v40 = vmul.f32 0.26894143, %v2436_v55  ;;  %v44_v55 = vld [vmem:[%s2724_s1 + $0x28] sm:$0xff]  ;;  %v2054_v2 = vmov 0  }
 0x7c6   :  { %v1453_v11 = vadd.f32 1.0, %v1451_v18  ;;  %1910 = vset.pattern.permute.xlu1 %v2054_v2  ;;  %1911 = vset.pattern.permute.xlu0 %v2054_v2 }
 0x7c7   :  { %v1560_v21 = vmul.f32 %v2012_v6, %v1550_v5 }
 0x7c8   :  { %v1455_v8 = vmul.f32 %v1453_v11, %v1377_v29 }
 0x7c9   :  { %v1562_v34 = vsub.f32 1.0, %v1560_v21 }
 0x7ca   :  { %1847 = vmatmul.msk.f32.gmra.mxu0 %vm66_vm0, %v1455_v8 }
 0x7cb   :  { %v1566_v14 = vsub.f32 0.0, %v1562_v34 }
 0x7cd   :  { %v1568_v56 = vsel %vm1564_vm12, %v1566_v14, %v1562_v34 }
 0x7ce   :  { %v1570_v16 = vadd.f32 1.0, %v1568_v56 }
 0x7d0   :  { %v1572_v10 = vmul.f32 %v1570_v16, %v1494_v20 }
 0x7d2   :  { %1852 = vmatmul.msk.f32.vlgmr.msra.gmra.mxu1 %vm66_vm0, %v1572_v10 }
 0x7da   :  { %1853 = vmatmul.msk.f32.gmra.mxu1 %vm66_vm0, %v1573_v7 }
 0x827   :  { %v1488_v15 = vpop.f32.mrf.mxu0 }
 0x828   :  { %v1489_v36 = vadd.f32 %v1488_v15, %v1463_v22 }
 0x82a   :  { %v1614_v17 = vadd.f32 %v1612_v32, %v1489_v36 }
 0x82c   :  { %1743 = vst.msk [vmem:[%s2729_s6] sm:$0xff] %vm66_vm0, %v1614_v17 }
 0x847   :  { %v1491_v59 = vpop.f32.mrf.mxu0 }
 0x848   :  { %v1492_v37 = vadd.f32 %v1491_v59, %v1463_v22 }
 0x84a   :  { %v1615_v42 = vadd.f32 %v1613_v38, %v1492_v37 }
 0x84c   :  { %1744 = vst.msk [vmem:[%s2729_s6 + $0x8] sm:$0xff] %vm66_vm0, %v1615_v42  ;;  %1637 = vmatpush.msra.mxu2 %v1615_v42 }
 0x84e   :  { %1638 = vmatpush.msra.mxu2 %v1614_v17 }
 0x84f   :  { %1854 = vmatmul.msk.f32.vlgmr.msra.gmra.mxu2 %vm198_vm1, %v43_v3  ;;  %v1606_v41 = vpop.f32.mrf.mxu1 }
 0x850   :  { %1681 = vmatpush.msrb.mxu2 %v56_v13  ;;  %v1607_v44 = vadd.f32 %v1606_v41, %v1581_v35 }
 0x852   :  { %1682 = vmatpush.msrb.mxu2 %v55_v4  ;;  %v1618_v47 = vadd.f32 %v1616_v40, %v1607_v44 }
 0x854   :  { %1683 = vmatpush.msrb.mxu2 %v54_v43  ;;  %1745 = vst.msk [vmem:[%s2729_s6 + $0x10] sm:$0xff] %vm66_vm0, %v1618_v47 }
 0x856   :  { %1684 = vmatpush.msrb.mxu2 %v53_v9 }
 0x857   :  { %v1609_v58 = vpop.f32.mrf.mxu1 }
 0x858   :  { %v1610_v23 = vadd.f32 %v1609_v58, %v1581_v35 }
 0x85a   :  { %v1619_v31 = vadd.f32 %v1617_v53, %v1610_v23 }
 0x85c   :  { %1746 = vst.msk [vmem:[%s2729_s6 + $0x18] sm:$0xff] %vm66_vm0, %v1619_v31  ;;  %1660 = vmatpush.msra.mxu3 %v1619_v31 }
 0x85e   :  { %1661 = vmatpush.msra.mxu3 %v1618_v47 }
 0x85f   :  { %1855 = vmatmul.msk.f32.vlgmr.msra.gmra.mxu3 %vm198_vm1, %v44_v55 }
 0x860   :  { %1704 = vmatpush.msrb.mxu3 %v52_v27 }
 0x862   :  { %1705 = vmatpush.msrb.mxu3 %v51_v25 }
 0x864   :  { %1706 = vmatpush.msrb.mxu3 %v50_v19 }
 0x866   :  { %1707 = vmatpush.msrb.mxu3 %v49_v24 }
 0x8d2   :  { %v1640_v60 = vpop.f32.mrf.mxu2 }
 0x8d3   :  { %1857 = vmatmul.msk.f32.vlgmr.msrb.gmra.mxu3 %vm66_vm0, %v1640_v60 }
 0x8e2   :  { %v1663_v51 = vpop.f32.mrf.mxu3 }
 0x8e3   :  { %1856 = vmatmul.msk.f32.vlgmr.msrb.gmra.mxu2 %vm66_vm0, %v1663_v51 }
 0x956   :  { %v1709_v0 = vpop.f32.mrf.mxu3 }
 0x966   :  { %v1686_v57 = vpop.f32.mrf.mxu2 }
 0x967   :  { %v1710_v61 = vadd.f32 %v1709_v0, %v1686_v57 }
 0x969   :  { %v1715_v63 = vadd.f32 %v1713_v45, %v1710_v61 }
 0x96b   :  { %v1716_v1 = vmax.f32 %v1715_v63, 0.0 }
 0x96d   :  { %1858 = vmatmul.msk.f32.vlgmr.msra.gmra.mxu0 %vm66_vm0, %v1716_v1 }
 0x9ea   :  { %v1740_v26 = vpop.f32.mrf.mxu0 }
 0x9eb   :  { %v1741_v18 = vadd.f32 %v1740_v26, %v1718_v39 }
 0x9ed   :  { %1749 = vperm.xlu1 %1910, %v1741_v18  }
 0xa5f   :  { %v1750_v28 = vpop.permute.xlu1 %1749 }
 0xa60   :  { %1752 = vst.msk [vmem:[%s2729_s6 + $0x20] sm:$0xff] %vm66_vm0, %v1750_v28 }
 0xa61   :  { %1757 = vsyncpa [#allocation3], 1 }

</bundles_post_ra>
